<compile_context>
chip_gen: v7x
topology: tpu7x:2x2x1
jax: 0.10.0
libtpu: 0.0.40
codegen_flags: <defaults>
</compile_context>

<pallas_src>
import numpy as np
import jax
import jax.numpy as jnp
from jax.experimental import pallas as pl
from jax.experimental.pallas import tpu as pltpu

EPS = 1e-5


# --------------------------- host-side weight prep ---------------------------

def _grouped_to_dense(wg, groups):
    """PyTorch grouped conv weight (Cout, Cin/g, 3, 3) -> dense (Cout, Cin, 3, 3)."""
    wg = np.asarray(wg, np.float32)
    Cout, Cin_g, kh, kw = wg.shape
    Cin = Cin_g * groups
    Cout_g = Cout // groups
    w = np.zeros((Cout, Cin, kh, kw), np.float32)
    for g in range(groups):
        w[g * Cout_g:(g + 1) * Cout_g, g * Cin_g:(g + 1) * Cin_g] = \
            wg[g * Cout_g:(g + 1) * Cout_g]
    return w


def _bn_scale_shift(p):
    scale = np.asarray(p["bn_gamma"]) / np.sqrt(np.asarray(p["bn_var"]) + EPS)
    shift = np.asarray(p["bn_beta"]) - np.asarray(p["bn_mean"]) * scale
    return scale.astype(np.float32), shift.astype(np.float32)


def _build_conv_matrix(w_dense, bn_scale, H, W, Cin, Cout, stride):
    """Lowered conv matrix A of shape (3*(W+2)*Cin, Wo*Cout).

    With rows_di[i, wcol*Cin+ci] = xpad[stride*i+di, wcol, ci] (pad = 1), the
    conv + folded-BN-scale output is
        Y[i, j*Cout+co] = sum_di rows_di[i, :] @ A[di-block][:, j*Cout+co].
    """
    Ho = (H + 2 - 3) // stride + 1
    Wo = (W + 2 - 3) // stride + 1
    Wp = (W + 2) * Cin
    A = np.zeros((3, Wp, Wo * Cout), np.float32)
    for di in range(3):
        for dj in range(3):
            for j in range(Wo):
                wcol = stride * j + dj
                for ci in range(Cin):
                    A[di, wcol * Cin + ci, j * Cout:(j + 1) * Cout] += \
                        w_dense[:, ci, di, dj] * bn_scale
    return A.reshape(3 * Wp, Wo * Cout), Ho, Wo


def prepare_fused(params, cfg):
    """Fold BN scale / layout permutations into the weights; return flat arrays
    + static per-layer metadata for the fused kernel."""
    ch = cfg["channels"]
    H, W = cfg["xsize"], cfg["ysize"]
    layers, arrays = [], []
    curH, curW, cur_c = H, W, cfg["input_channels"]

    def add_conv(p, w_dense, Cin, Cout, stride, residual):
        nonlocal curH, curW, cur_c
        scale, shift = _bn_scale_shift(p)
        A, Ho, Wo = _build_conv_matrix(w_dense, scale, curH, curW, Cin, Cout, stride)
        arrays.append(jnp.asarray(A, jnp.bfloat16))
        arrays.append(jnp.asarray(np.tile(shift, Wo)[None, :], jnp.float32))
        arrays.append(jnp.asarray(
            np.tile(np.asarray(p["prelu_alpha"], np.float32), Wo)[None, :], jnp.float32))
        layers.append(dict(H=curH, W=curW, Cin=Cin, Cout=Cout, Ho=Ho, Wo=Wo,
                           stride=stride, residual=residual))
        curH, curW, cur_c = Ho, Wo, Cout

    for i, blk in enumerate(params["blocks"]):
        if cfg["reduce_size"] or i == 0:
            p = blk["down"]
            add_conv(p, np.asarray(p["w"], np.float32), cur_c, ch, 2, False)
        p = blk["res"]
        add_conv(p, _grouped_to_dense(p["w"], ch // 2), ch, ch, 1, True)

    hp = params["head"]
    Hf, Wf, Cf = curH, curW, ch
    feat = Hf * Wf * Cf
    E = np.asarray(hp["w1"]).shape[1]
    nclass = np.asarray(hp["w2"]).shape[1]
    scale1, shift1 = _bn_scale_shift(hp)
    # w1 rows are in PyTorch NCHW-flatten order -> permute to our NHWC (h,w,c)
    # order and fold the BatchNorm1d scale into the output columns.
    w1 = np.asarray(hp["w1"], np.float32)
    w1 = w1.reshape(Cf, Hf, Wf, E).transpose(1, 2, 0, 3).reshape(feat, E) * scale1[None, :]
    arrays += [jnp.asarray(w1, jnp.bfloat16),
               jnp.asarray(shift1[None, :], jnp.float32),
               jnp.asarray(np.asarray(hp["w2"], np.float32), jnp.bfloat16),
               jnp.asarray(np.asarray(hp["b2"], np.float32)[None, :], jnp.float32)]
    head = dict(Hf=Hf, Wf=Wf, Cf=Cf, E=E, nclass=nclass)
    return dict(arrays=arrays, layers=layers, head=head,
                mean=float(cfg["mean"]), inv_std=1.0 / float(cfg["std"]))


# ------------------------------- fused kernel --------------------------------

def _make_kernel(layers, head, mean, inv_std):
    n_layers = len(layers)

    def kernel(x_ref, *refs):
        conv_refs = [refs[3 * l:3 * l + 3] for l in range(n_layers)]
        w1_ref, s1_ref, w2_ref, b2_ref = refs[3 * n_layers:3 * n_layers + 4]
        out_ref = refs[3 * n_layers + 4]

        # ---- InputNorm (applied before zero padding, exact semantics) ----
        x = (x_ref[0].astype(jnp.float32) - mean) * inv_std        # (H, W*Cin)

        # ---- Conv(3x3, no bias) + BN(eval) + PReLU (+ residual) stack ----
        for meta, (a_ref, sh_ref, al_ref) in zip(layers, conv_refs):
            H, W, Cin = meta["H"], meta["W"], meta["Cin"]
            Ho, s = meta["Ho"], meta["stride"]
            Wp = (W + 2) * Cin
            # zero-pad to (H+2, (W+2)*Cin) purely in registers
            zc = jnp.zeros((H, Cin), jnp.float32)
            zr = jnp.zeros((1, Wp), jnp.float32)
            xp = jnp.concatenate(
                [zr, jnp.concatenate([zc, x, zc], axis=1), zr], axis=0)
            xp = xp.astype(jnp.bfloat16)                            # (H+2, Wp)
            rows = []
            for di in range(3):
                if s == 1:
                    rows.append(xp[di:di + Ho, :])
                else:
                    # stride-2 row subsampling as a tiny 0/1 selection matmul
                    lane = jax.lax.broadcasted_iota(jnp.int32, (Ho, H + 2), 1)
                    tgt = s * jax.lax.broadcasted_iota(jnp.int32, (Ho, H + 2), 0) + di
                    sel = jnp.where(lane == tgt, 1.0, 0.0).astype(jnp.bfloat16)
                    r = jnp.dot(sel, xp, preferred_element_type=jnp.float32)
                    rows.append(r.astype(jnp.bfloat16))
            rows_cat = jnp.concatenate(rows, axis=1)                # (Ho, 3*Wp)
            y = jnp.dot(rows_cat, a_ref[...],                       # conv + BN scale
                        preferred_element_type=jnp.float32)         # (Ho, Wo*Cout)
            y = y + sh_ref[...]                                     # BN shift
            y = jnp.where(y >= 0.0, y, al_ref[...] * y)             # PReLU
            # Dropout3d: identity in eval mode
            if meta["residual"]:
                y = y + x
            x = y

        # ---- Head: Linear(+BN1d folded) -> L2Norm -> Linear+bias -> LogSoftmax
        Hf, Wf, Cf, E = head["Hf"], head["Wf"], head["Cf"], head["E"]
        rowlen = Wf * Cf
        xb = x.astype(jnp.bfloat16)
        emb = jnp.zeros((1, E), jnp.float32)
        for h in range(Hf):                    # flatten via row-block matmuls (no reshape)
            emb = emb + jnp.dot(xb[h:h + 1, :],
                                w1_ref[h * rowlen:(h + 1) * rowlen, :],
                                preferred_element_type=jnp.float32)
        emb = emb + s1_ref[...]
        # L2Norm; tiny eps only guards the all-zero-row NaN case.
        emb = emb * jax.lax.rsqrt(jnp.sum(emb * emb, axis=1, keepdims=True) + 1e-12)
        # TODO(synk): return_embedding=True early-exit path is not exposed.
        logits = jnp.dot(emb.astype(jnp.bfloat16), w2_ref[...],
                         preferred_element_type=jnp.float32) + b2_ref[...]
        z = logits - jnp.max(logits, axis=1, keepdims=True)
        out_ref[0] = z - jnp.log(jnp.sum(jnp.exp(z), axis=1, keepdims=True))

    return kernel


def simple_cnn_forward(x_nchw, fused):
    """Full SimpleCNN forward (eval) in one pallas_call, gridded over batch."""
    B, Cin, H, W = x_nchw.shape
    # NCHW -> per-sample (H, W*Cin) layout (channels innermost on the lane axis)
    x2d = jnp.transpose(x_nchw, (0, 2, 3, 1)).reshape(B, H, W * Cin)
    arrays = fused["arrays"]
    nclass = fused["head"]["nclass"]
    kernel = _make_kernel(fused["layers"], fused["head"], fused["mean"], fused["inv_std"])

    weight_specs = [pl.BlockSpec(a.shape, lambda b: (0, 0)) for a in arrays]
    out = pl.pallas_call(
        kernel,
        out_shape=jax.ShapeDtypeStruct((B, 1, nclass), jnp.float32),
        grid=(B,),
        in_specs=[pl.BlockSpec((1, H, W * Cin), lambda b: (b, 0, 0))] + weight_specs,
        out_specs=pl.BlockSpec((1, 1, nclass), lambda b: (b, 0, 0)),
        compiler_params=pltpu.CompilerParams(dimension_semantics=("parallel",)),
    )(x2d, *arrays)
    return out.reshape(B, nclass)


# ------------------------------ params & reference ---------------------------

def init_params(key, cfg):
    ch, in_ch = cfg["channels"], cfg["input_channels"]
    keys = iter(jax.random.split(key, 64))

    def bn(c):
        return dict(
            bn_gamma=jax.random.uniform(next(keys), (c,), jnp.float32, 0.5, 1.5),
            bn_beta=0.1 * jax.random.normal(next(keys), (c,), jnp.float32),
            bn_mean=0.1 * jax.random.normal(next(keys), (c,), jnp.float32),
            bn_var=jax.random.uniform(next(keys), (c,), jnp.float32, 0.5, 1.5))

    params = {"blocks": []}
    tmp_x, tmp_y = cfg["xsize"], cfg["ysize"]
    for i in range(1, cfg["num_blocks"] + 1):
        blk = {}
        if cfg["reduce_size"] or i == 1:
            cin = in_ch if i == 1 else ch
            blk["down"] = dict(
                w=0.1 * jax.random.normal(next(keys), (ch, cin, 3, 3), jnp.float32),
                prelu_alpha=jnp.full((ch,), 0.25, jnp.float32), **bn(ch))
            tmp_x //= 2
            tmp_y //= 2
        groups = ch // 2
        blk["res"] = dict(
            w=0.1 * jax.random.normal(next(keys), (ch, ch // groups, 3, 3), jnp.float32),
            prelu_alpha=jnp.full((ch,), 0.25, jnp.float32), **bn(ch))
        params["blocks"].append(blk)

    feat = tmp_x * tmp_y * ch
    E, C = cfg["embedding_size"], len(cfg["vocab"])
    params["head"] = dict(
        w1=0.05 * jax.random.normal(next(keys), (feat, E), jnp.float32),
        w2=0.05 * jax.random.normal(next(keys), (E, C), jnp.float32),
        b2=0.1 * jax.random.normal(next(keys), (C,), jnp.float32),
        **bn(E))
    return params


def reference_forward(x_nchw, params, cfg):
    """Plain-JAX (XLA) eval-mode reference, f32 end to end."""
    out = (x_nchw - cfg["mean"]) / cfg["std"]

    def convblock(x, p, stride, groups, residual):
        y = jax.lax.conv_general_dilated(
            x, p["w"], window_strides=(stride, stride), padding=((1, 1), (1, 1)),
            dimension_numbers=("NCHW", "OIHW", "NCHW"), feature_group_count=groups)
        scale = p["bn_gamma"] / jnp.sqrt(p["bn_var"] + EPS)
        shift = p["bn_beta"] - p["bn_mean"] * scale
        y = y * scale[None, :, None, None] + shift[None, :, None, None]
        y = jnp.where(y >= 0, y, p["prelu_alpha"][None, :, None, None] * y)
        return y + x if residual else y

    for i, blk in enumerate(params["blocks"]):
        if cfg["reduce_size"] or i == 0:
            out = convblock(out, blk["down"], 2, 1, False)
        out = convblock(out, blk["res"], 1, cfg["channels"] // 2, True)
    flat = out.reshape(out.shape[0], -1)
    hp = params["head"]
    z = flat @ hp["w1"]
    scale = hp["bn_gamma"] / jnp.sqrt(hp["bn_var"] + EPS)
    z = z * scale + (hp["bn_beta"] - hp["bn_mean"] * scale)
    z = z / jnp.sqrt(jnp.sum(z * z, axis=1, keepdims=True))
    logits = z @ hp["w2"] + hp["b2"]
    return jax.nn.log_softmax(logits, axis=1)


# ----------------------------------- main ------------------------------------

if __name__ == "__main__":
    cfg = dict(
        xsize=16, ysize=16, num_blocks=2, channels=8, input_channels=1,
        reduce_size=False, dropout=0.2, embedding_size=32,
        vocab=[str(i) for i in range(10)], mean=0.45, std=0.22)
    key = jax.random.PRNGKey(0)
    k_param, k_x = jax.random.split(key)
    params = init_params(k_param, cfg)
    fused = prepare_fused(params, cfg)

    x = jax.random.normal(
        k_x, (2, cfg["input_channels"], cfg["xsize"], cfg["ysize"]), jnp.float32)

    fwd = jax.jit(lambda xx: simple_cnn_forward(xx, fused))
    logprobs = jax.block_until_ready(fwd(x))

    assert logprobs.shape == (2, len(cfg["vocab"]))
    assert bool(jnp.all(jnp.isfinite(logprobs)))
    # log-softmax rows should sum (in prob space) to ~1
    assert bool(jnp.allclose(jnp.sum(jnp.exp(logprobs), axis=1), 1.0, atol=1e-3))
    # compare against a plain-JAX f32 reference (kernel uses bf16 matmuls)
    ref = jax.block_until_ready(reference_forward(x, params, cfg))
    max_err = float(jnp.max(jnp.abs(logprobs - ref)))
    assert max_err < 5e-2, f"mismatch vs reference: max |diff| = {max_err}"
    print("KERNEL_OK")
</pallas_src>

<mosaic_0001>
module attributes {stable_mosaic.version = 11 : i64} {
  func.func @kernel(%arg0: i32, %arg1: memref<1x16x16xf32, #tpu.memory_space<vmem>>, %arg2: memref<54x64xbf16, #tpu.memory_space<vmem>>, %arg3: memref<1x64xf32, #tpu.memory_space<vmem>>, %arg4: memref<1x64xf32, #tpu.memory_space<vmem>>, %arg5: memref<240x64xbf16, #tpu.memory_space<vmem>>, %arg6: memref<1x64xf32, #tpu.memory_space<vmem>>, %arg7: memref<1x64xf32, #tpu.memory_space<vmem>>, %arg8: memref<240x64xbf16, #tpu.memory_space<vmem>>, %arg9: memref<1x64xf32, #tpu.memory_space<vmem>>, %arg10: memref<1x64xf32, #tpu.memory_space<vmem>>, %arg11: memref<512x32xbf16, #tpu.memory_space<vmem>>, %arg12: memref<1x32xf32, #tpu.memory_space<vmem>>, %arg13: memref<32x10xbf16, #tpu.memory_space<vmem>>, %arg14: memref<1x10xf32, #tpu.memory_space<vmem>>, %arg15: memref<1x1x10xf32, #tpu.memory_space<vmem>>) attributes {dimension_semantics = [#tpu.dimension_semantics<parallel>], iteration_bounds = array<i64: 2>, scalar_prefetch = 0 : i64, scratch_operands = 0 : i64, tpu.core_type = #tpu.core_type<tc>, window_params = [{transform_indices = @transform_0, window_bounds = array<i64: 1, 16, 16>}, {pipeline_mode = #tpu.pipeline_mode<synchronous>, transform_indices = @transform_1, window_bounds = array<i64: 54, 64>}, {pipeline_mode = #tpu.pipeline_mode<synchronous>, transform_indices = @transform_2, window_bounds = array<i64: 1, 64>}, {pipeline_mode = #tpu.pipeline_mode<synchronous>, transform_indices = @transform_3, window_bounds = array<i64: 1, 64>}, {pipeline_mode = #tpu.pipeline_mode<synchronous>, transform_indices = @transform_4, window_bounds = array<i64: 240, 64>}, {pipeline_mode = #tpu.pipeline_mode<synchronous>, transform_indices = @transform_5, window_bounds = array<i64: 1, 64>}, {pipeline_mode = #tpu.pipeline_mode<synchronous>, transform_indices = @transform_6, window_bounds = array<i64: 1, 64>}, {pipeline_mode = #tpu.pipeline_mode<synchronous>, transform_indices = @transform_7, window_bounds = array<i64: 240, 64>}, {pipeline_mode = #tpu.pipeline_mode<synchronous>, transform_indices = @transform_8, window_bounds = array<i64: 1, 64>}, {pipeline_mode = #tpu.pipeline_mode<synchronous>, transform_indices = @transform_9, window_bounds = array<i64: 1, 64>}, {pipeline_mode = #tpu.pipeline_mode<synchronous>, transform_indices = @transform_10, window_bounds = array<i64: 512, 32>}, {pipeline_mode = #tpu.pipeline_mode<synchronous>, transform_indices = @transform_11, window_bounds = array<i64: 1, 32>}, {pipeline_mode = #tpu.pipeline_mode<synchronous>, transform_indices = @transform_12, window_bounds = array<i64: 32, 10>}, {pipeline_mode = #tpu.pipeline_mode<synchronous>, transform_indices = @transform_13, window_bounds = array<i64: 1, 10>}, {transform_indices = @transform_14, window_bounds = array<i64: 1, 1, 10>}]} {
    %c0 = arith.constant 0 : index
    %c0_0 = arith.constant 0 : index
    %c0_1 = arith.constant 0 : index
    %0 = vector.load %arg1[%c0, %c0_0, %c0_1] : memref<1x16x16xf32, #tpu.memory_space<vmem>>, vector<1x16x16xf32>
    %1 = vector.shape_cast %0 : vector<1x16x16xf32> to vector<16x16xf32>
    %cst = arith.constant 4.500000e-01 : f32
    %2 = vector.broadcast %cst : f32 to vector<16x16xf32>
    %3 = arith.subf %1, %2 : vector<16x16xf32>
    %cst_2 = arith.constant 4.5454545 : f32
    %4 = vector.broadcast %cst_2 : f32 to vector<16x16xf32>
    %5 = arith.mulf %3, %4 : vector<16x16xf32>
    %cst_3 = arith.constant 0.000000e+00 : f32
    %6 = vector.broadcast %cst_3 : f32 to vector<16x1xf32>
    %cst_4 = arith.constant 0.000000e+00 : f32
    %7 = vector.broadcast %cst_4 : f32 to vector<1x18xf32>
    %8 = tpu.concatenate %6, %5, %6 in 1 : vector<16x1xf32>, vector<16x16xf32>, vector<16x1xf32> -> vector<16x18xf32>
    %9 = tpu.concatenate %7, %8, %7 in 0 : vector<1x18xf32>, vector<16x18xf32>, vector<1x18xf32> -> vector<18x18xf32>
    %10 = arith.truncf %9 : vector<18x18xf32> to vector<18x18xbf16>
    %11 = tpu.iota {dimensions = array<i32: 1>} : vector<8x18xi32>
    %12 = tpu.iota {dimensions = array<i32: 0>} : vector<8x18xi32>
    %c2_i32 = arith.constant 2 : i32
    %13 = vector.broadcast %c2_i32 : i32 to vector<8x18xi32>
    %14 = arith.muli %13, %12 : vector<8x18xi32>
    %c0_i32 = arith.constant 0 : i32
    %15 = vector.broadcast %c0_i32 : i32 to vector<8x18xi32>
    %16 = arith.addi %14, %15 : vector<8x18xi32>
    %17 = arith.cmpi eq, %11, %16 : vector<8x18xi32>
    %cst_5 = arith.constant 1.000000e+00 : f32
    %cst_6 = arith.constant 0.000000e+00 : f32
    %18 = vector.broadcast %cst_5 : f32 to vector<8x18xf32>
    %19 = vector.broadcast %cst_6 : f32 to vector<8x18xf32>
    %20 = arith.select %17, %18, %19 : vector<8x18xi1>, vector<8x18xf32>
    %21 = arith.truncf %20 : vector<8x18xf32> to vector<8x18xbf16>
    %cst_7 = arith.constant dense<0.000000e+00> : vector<8x18xf32>
    %22 = tpu.matmul %21, %10, %cst_7 {dimension_numbers = #tpu.dot_dimension_numbers<[1], [0], [0], [1], [0, 0, 1, 1], [], []>} : vector<8x18xbf16>, vector<18x18xbf16>, vector<8x18xf32> -> vector<8x18xf32>
    %23 = arith.truncf %22 : vector<8x18xf32> to vector<8x18xbf16>
    %24 = tpu.iota {dimensions = array<i32: 1>} : vector<8x18xi32>
    %25 = tpu.iota {dimensions = array<i32: 0>} : vector<8x18xi32>
    %c2_i32_8 = arith.constant 2 : i32
    %26 = vector.broadcast %c2_i32_8 : i32 to vector<8x18xi32>
    %27 = arith.muli %26, %25 : vector<8x18xi32>
    %c1_i32 = arith.constant 1 : i32
    %28 = vector.broadcast %c1_i32 : i32 to vector<8x18xi32>
    %29 = arith.addi %27, %28 : vector<8x18xi32>
    %30 = arith.cmpi eq, %24, %29 : vector<8x18xi32>
    %cst_9 = arith.constant 1.000000e+00 : f32
    %cst_10 = arith.constant 0.000000e+00 : f32
    %31 = vector.broadcast %cst_9 : f32 to vector<8x18xf32>
    %32 = vector.broadcast %cst_10 : f32 to vector<8x18xf32>
    %33 = arith.select %30, %31, %32 : vector<8x18xi1>, vector<8x18xf32>
    %34 = arith.truncf %33 : vector<8x18xf32> to vector<8x18xbf16>
    %cst_11 = arith.constant dense<0.000000e+00> : vector<8x18xf32>
    %35 = tpu.matmul %34, %10, %cst_11 {dimension_numbers = #tpu.dot_dimension_numbers<[1], [0], [0], [1], [0, 0, 1, 1], [], []>} : vector<8x18xbf16>, vector<18x18xbf16>, vector<8x18xf32> -> vector<8x18xf32>
    %36 = arith.truncf %35 : vector<8x18xf32> to vector<8x18xbf16>
    %37 = tpu.iota {dimensions = array<i32: 1>} : vector<8x18xi32>
    %38 = tpu.iota {dimensions = array<i32: 0>} : vector<8x18xi32>
    %c2_i32_12 = arith.constant 2 : i32
    %39 = vector.broadcast %c2_i32_12 : i32 to vector<8x18xi32>
    %40 = arith.muli %39, %38 : vector<8x18xi32>
    %c2_i32_13 = arith.constant 2 : i32
    %41 = vector.broadcast %c2_i32_13 : i32 to vector<8x18xi32>
    %42 = arith.addi %40, %41 : vector<8x18xi32>
    %43 = arith.cmpi eq, %37, %42 : vector<8x18xi32>
    %cst_14 = arith.constant 1.000000e+00 : f32
    %cst_15 = arith.constant 0.000000e+00 : f32
    %44 = vector.broadcast %cst_14 : f32 to vector<8x18xf32>
    %45 = vector.broadcast %cst_15 : f32 to vector<8x18xf32>
    %46 = arith.select %43, %44, %45 : vector<8x18xi1>, vector<8x18xf32>
    %47 = arith.truncf %46 : vector<8x18xf32> to vector<8x18xbf16>
    %cst_16 = arith.constant dense<0.000000e+00> : vector<8x18xf32>
    %48 = tpu.matmul %47, %10, %cst_16 {dimension_numbers = #tpu.dot_dimension_numbers<[1], [0], [0], [1], [0, 0, 1, 1], [], []>} : vector<8x18xbf16>, vector<18x18xbf16>, vector<8x18xf32> -> vector<8x18xf32>
    %49 = arith.truncf %48 : vector<8x18xf32> to vector<8x18xbf16>
    %50 = tpu.concatenate %23, %36, %49 in 1 : vector<8x18xbf16>, vector<8x18xbf16>, vector<8x18xbf16> -> vector<8x54xbf16>
    %c0_17 = arith.constant 0 : index
    %c0_18 = arith.constant 0 : index
    %51 = vector.load %arg2[%c0_17, %c0_18] : memref<54x64xbf16, #tpu.memory_space<vmem>>, vector<54x64xbf16>
    %cst_19 = arith.constant dense<0.000000e+00> : vector<8x64xf32>
    %52 = tpu.matmul %50, %51, %cst_19 {dimension_numbers = #tpu.dot_dimension_numbers<[1], [0], [0], [1], [0, 0, 1, 1], [], []>} : vector<8x54xbf16>, vector<54x64xbf16>, vector<8x64xf32> -> vector<8x64xf32>
    %c0_20 = arith.constant 0 : index
    %c0_21 = arith.constant 0 : index
    %53 = vector.load %arg3[%c0_20, %c0_21] : memref<1x64xf32, #tpu.memory_space<vmem>>, vector<1x64xf32>
    %54 = vector.broadcast %53 : vector<1x64xf32> to vector<8x64xf32>
    %55 = arith.addf %52, %54 : vector<8x64xf32>
    %cst_22 = arith.constant 0.000000e+00 : f32
    %56 = vector.broadcast %cst_22 : f32 to vector<8x64xf32>
    %57 = arith.cmpf oge, %55, %56 : vector<8x64xf32>
    %c0_23 = arith.constant 0 : index
    %c0_24 = arith.constant 0 : index
    %58 = vector.load %arg4[%c0_23, %c0_24] : memref<1x64xf32, #tpu.memory_space<vmem>>, vector<1x64xf32>
    %59 = vector.broadcast %58 : vector<1x64xf32> to vector<8x64xf32>
    %60 = arith.mulf %59, %55 : vector<8x64xf32>
    %61 = arith.select %57, %55, %60 : vector<8x64xi1>, vector<8x64xf32>
    %cst_25 = arith.constant 0.000000e+00 : f32
    %62 = vector.broadcast %cst_25 : f32 to vector<8x8xf32>
    %cst_26 = arith.constant 0.000000e+00 : f32
    %63 = vector.broadcast %cst_26 : f32 to vector<1x80xf32>
    %64 = tpu.concatenate %62, %61, %62 in 1 : vector<8x8xf32>, vector<8x64xf32>, vector<8x8xf32> -> vector<8x80xf32>
    %65 = tpu.concatenate %63, %64, %63 in 0 : vector<1x80xf32>, vector<8x80xf32>, vector<1x80xf32> -> vector<10x80xf32>
    %66 = arith.truncf %65 : vector<10x80xf32> to vector<10x80xbf16>
    %67 = vector.extract_strided_slice %66 {offsets = [0, 0], sizes = [8, 80], strides = [1, 1]} : vector<10x80xbf16> to vector<8x80xbf16>
    %68 = vector.extract_strided_slice %66 {offsets = [1, 0], sizes = [8, 80], strides = [1, 1]} : vector<10x80xbf16> to vector<8x80xbf16>
    %69 = vector.extract_strided_slice %66 {offsets = [2, 0], sizes = [8, 80], strides = [1, 1]} : vector<10x80xbf16> to vector<8x80xbf16>
    %70 = tpu.concatenate %67, %68, %69 in 1 : vector<8x80xbf16>, vector<8x80xbf16>, vector<8x80xbf16> -> vector<8x240xbf16>
    %c0_27 = arith.constant 0 : index
    %c0_28 = arith.constant 0 : index
    %71 = vector.load %arg5[%c0_27, %c0_28] : memref<240x64xbf16, #tpu.memory_space<vmem>>, vector<240x64xbf16>
    %cst_29 = arith.constant dense<0.000000e+00> : vector<8x64xf32>
    %72 = tpu.matmul %70, %71, %cst_29 {dimension_numbers = #tpu.dot_dimension_numbers<[1], [0], [0], [1], [0, 0, 1, 1], [], []>} : vector<8x240xbf16>, vector<240x64xbf16>, vector<8x64xf32> -> vector<8x64xf32>
    %c0_30 = arith.constant 0 : index
    %c0_31 = arith.constant 0 : index
    %73 = vector.load %arg6[%c0_30, %c0_31] : memref<1x64xf32, #tpu.memory_space<vmem>>, vector<1x64xf32>
    %74 = vector.broadcast %73 : vector<1x64xf32> to vector<8x64xf32>
    %75 = arith.addf %72, %74 : vector<8x64xf32>
    %cst_32 = arith.constant 0.000000e+00 : f32
    %76 = vector.broadcast %cst_32 : f32 to vector<8x64xf32>
    %77 = arith.cmpf oge, %75, %76 : vector<8x64xf32>
    %c0_33 = arith.constant 0 : index
    %c0_34 = arith.constant 0 : index
    %78 = vector.load %arg7[%c0_33, %c0_34] : memref<1x64xf32, #tpu.memory_space<vmem>>, vector<1x64xf32>
    %79 = vector.broadcast %78 : vector<1x64xf32> to vector<8x64xf32>
    %80 = arith.mulf %79, %75 : vector<8x64xf32>
    %81 = arith.select %77, %75, %80 : vector<8x64xi1>, vector<8x64xf32>
    %82 = arith.addf %81, %61 : vector<8x64xf32>
    %cst_35 = arith.constant 0.000000e+00 : f32
    %83 = vector.broadcast %cst_35 : f32 to vector<8x8xf32>
    %cst_36 = arith.constant 0.000000e+00 : f32
    %84 = vector.broadcast %cst_36 : f32 to vector<1x80xf32>
    %85 = tpu.concatenate %83, %82, %83 in 1 : vector<8x8xf32>, vector<8x64xf32>, vector<8x8xf32> -> vector<8x80xf32>
    %86 = tpu.concatenate %84, %85, %84 in 0 : vector<1x80xf32>, vector<8x80xf32>, vector<1x80xf32> -> vector<10x80xf32>
    %87 = arith.truncf %86 : vector<10x80xf32> to vector<10x80xbf16>
    %88 = vector.extract_strided_slice %87 {offsets = [0, 0], sizes = [8, 80], strides = [1, 1]} : vector<10x80xbf16> to vector<8x80xbf16>
    %89 = vector.extract_strided_slice %87 {offsets = [1, 0], sizes = [8, 80], strides = [1, 1]} : vector<10x80xbf16> to vector<8x80xbf16>
    %90 = vector.extract_strided_slice %87 {offsets = [2, 0], sizes = [8, 80], strides = [1, 1]} : vector<10x80xbf16> to vector<8x80xbf16>
    %91 = tpu.concatenate %88, %89, %90 in 1 : vector<8x80xbf16>, vector<8x80xbf16>, vector<8x80xbf16> -> vector<8x240xbf16>
    %c0_37 = arith.constant 0 : index
    %c0_38 = arith.constant 0 : index
    %92 = vector.load %arg8[%c0_37, %c0_38] : memref<240x64xbf16, #tpu.memory_space<vmem>>, vector<240x64xbf16>
    %cst_39 = arith.constant dense<0.000000e+00> : vector<8x64xf32>
    %93 = tpu.matmul %91, %92, %cst_39 {dimension_numbers = #tpu.dot_dimension_numbers<[1], [0], [0], [1], [0, 0, 1, 1], [], []>} : vector<8x240xbf16>, vector<240x64xbf16>, vector<8x64xf32> -> vector<8x64xf32>
    %c0_40 = arith.constant 0 : index
    %c0_41 = arith.constant 0 : index
    %94 = vector.load %arg9[%c0_40, %c0_41] : memref<1x64xf32, #tpu.memory_space<vmem>>, vector<1x64xf32>
    %95 = vector.broadcast %94 : vector<1x64xf32> to vector<8x64xf32>
    %96 = arith.addf %93, %95 : vector<8x64xf32>
    %cst_42 = arith.constant 0.000000e+00 : f32
    %97 = vector.broadcast %cst_42 : f32 to vector<8x64xf32>
    %98 = arith.cmpf oge, %96, %97 : vector<8x64xf32>
    %c0_43 = arith.constant 0 : index
    %c0_44 = arith.constant 0 : index
    %99 = vector.load %arg10[%c0_43, %c0_44] : memref<1x64xf32, #tpu.memory_space<vmem>>, vector<1x64xf32>
    %100 = vector.broadcast %99 : vector<1x64xf32> to vector<8x64xf32>
    %101 = arith.mulf %100, %96 : vector<8x64xf32>
    %102 = arith.select %98, %96, %101 : vector<8x64xi1>, vector<8x64xf32>
    %103 = arith.addf %102, %82 : vector<8x64xf32>
    %104 = arith.truncf %103 : vector<8x64xf32> to vector<8x64xbf16>
    %cst_45 = arith.constant 0.000000e+00 : f32
    %105 = vector.broadcast %cst_45 : f32 to vector<1x32xf32>
    %106 = vector.extract_strided_slice %104 {offsets = [0, 0], sizes = [1, 64], strides = [1, 1]} : vector<8x64xbf16> to vector<1x64xbf16>
    %c0_46 = arith.constant 0 : index
    %c0_47 = arith.constant 0 : index
    %107 = vector.load %arg11[%c0_46, %c0_47] : memref<512x32xbf16, #tpu.memory_space<vmem>>, vector<64x32xbf16>
    %cst_48 = arith.constant dense<0.000000e+00> : vector<1x32xf32>
    %108 = tpu.matmul %106, %107, %cst_48 {dimension_numbers = #tpu.dot_dimension_numbers<[1], [0], [0], [1], [0, 0, 1, 1], [], []>} : vector<1x64xbf16>, vector<64x32xbf16>, vector<1x32xf32> -> vector<1x32xf32>
    %109 = arith.addf %105, %108 : vector<1x32xf32>
    %110 = vector.extract_strided_slice %104 {offsets = [1, 0], sizes = [1, 64], strides = [1, 1]} : vector<8x64xbf16> to vector<1x64xbf16>
    %c64 = arith.constant 64 : index
    %c0_49 = arith.constant 0 : index
    %111 = vector.load %arg11[%c64, %c0_49] : memref<512x32xbf16, #tpu.memory_space<vmem>>, vector<64x32xbf16>
    %cst_50 = arith.constant dense<0.000000e+00> : vector<1x32xf32>
    %112 = tpu.matmul %110, %111, %cst_50 {dimension_numbers = #tpu.dot_dimension_numbers<[1], [0], [0], [1], [0, 0, 1, 1], [], []>} : vector<1x64xbf16>, vector<64x32xbf16>, vector<1x32xf32> -> vector<1x32xf32>
    %113 = arith.addf %109, %112 : vector<1x32xf32>
    %114 = vector.extract_strided_slice %104 {offsets = [2, 0], sizes = [1, 64], strides = [1, 1]} : vector<8x64xbf16> to vector<1x64xbf16>
    %c128 = arith.constant 128 : index
    %c0_51 = arith.constant 0 : index
    %115 = vector.load %arg11[%c128, %c0_51] : memref<512x32xbf16, #tpu.memory_space<vmem>>, vector<64x32xbf16>
    %cst_52 = arith.constant dense<0.000000e+00> : vector<1x32xf32>
    %116 = tpu.matmul %114, %115, %cst_52 {dimension_numbers = #tpu.dot_dimension_numbers<[1], [0], [0], [1], [0, 0, 1, 1], [], []>} : vector<1x64xbf16>, vector<64x32xbf16>, vector<1x32xf32> -> vector<1x32xf32>
    %117 = arith.addf %113, %116 : vector<1x32xf32>
    %118 = vector.extract_strided_slice %104 {offsets = [3, 0], sizes = [1, 64], strides = [1, 1]} : vector<8x64xbf16> to vector<1x64xbf16>
    %c192 = arith.constant 192 : index
    %c0_53 = arith.constant 0 : index
    %119 = vector.load %arg11[%c192, %c0_53] : memref<512x32xbf16, #tpu.memory_space<vmem>>, vector<64x32xbf16>
    %cst_54 = arith.constant dense<0.000000e+00> : vector<1x32xf32>
    %120 = tpu.matmul %118, %119, %cst_54 {dimension_numbers = #tpu.dot_dimension_numbers<[1], [0], [0], [1], [0, 0, 1, 1], [], []>} : vector<1x64xbf16>, vector<64x32xbf16>, vector<1x32xf32> -> vector<1x32xf32>
    %121 = arith.addf %117, %120 : vector<1x32xf32>
    %122 = vector.extract_strided_slice %104 {offsets = [4, 0], sizes = [1, 64], strides = [1, 1]} : vector<8x64xbf16> to vector<1x64xbf16>
    %c256 = arith.constant 256 : index
    %c0_55 = arith.constant 0 : index
    %123 = vector.load %arg11[%c256, %c0_55] : memref<512x32xbf16, #tpu.memory_space<vmem>>, vector<64x32xbf16>
    %cst_56 = arith.constant dense<0.000000e+00> : vector<1x32xf32>
    %124 = tpu.matmul %122, %123, %cst_56 {dimension_numbers = #tpu.dot_dimension_numbers<[1], [0], [0], [1], [0, 0, 1, 1], [], []>} : vector<1x64xbf16>, vector<64x32xbf16>, vector<1x32xf32> -> vector<1x32xf32>
    %125 = arith.addf %121, %124 : vector<1x32xf32>
    %126 = vector.extract_strided_slice %104 {offsets = [5, 0], sizes = [1, 64], strides = [1, 1]} : vector<8x64xbf16> to vector<1x64xbf16>
    %c320 = arith.constant 320 : index
    %c0_57 = arith.constant 0 : index
    %127 = vector.load %arg11[%c320, %c0_57] : memref<512x32xbf16, #tpu.memory_space<vmem>>, vector<64x32xbf16>
    %cst_58 = arith.constant dense<0.000000e+00> : vector<1x32xf32>
    %128 = tpu.matmul %126, %127, %cst_58 {dimension_numbers = #tpu.dot_dimension_numbers<[1], [0], [0], [1], [0, 0, 1, 1], [], []>} : vector<1x64xbf16>, vector<64x32xbf16>, vector<1x32xf32> -> vector<1x32xf32>
    %129 = arith.addf %125, %128 : vector<1x32xf32>
    %130 = vector.extract_strided_slice %104 {offsets = [6, 0], sizes = [1, 64], strides = [1, 1]} : vector<8x64xbf16> to vector<1x64xbf16>
    %c384 = arith.constant 384 : index
    %c0_59 = arith.constant 0 : index
    %131 = vector.load %arg11[%c384, %c0_59] : memref<512x32xbf16, #tpu.memory_space<vmem>>, vector<64x32xbf16>
    %cst_60 = arith.constant dense<0.000000e+00> : vector<1x32xf32>
    %132 = tpu.matmul %130, %131, %cst_60 {dimension_numbers = #tpu.dot_dimension_numbers<[1], [0], [0], [1], [0, 0, 1, 1], [], []>} : vector<1x64xbf16>, vector<64x32xbf16>, vector<1x32xf32> -> vector<1x32xf32>
    %133 = arith.addf %129, %132 : vector<1x32xf32>
    %134 = vector.extract_strided_slice %104 {offsets = [7, 0], sizes = [1, 64], strides = [1, 1]} : vector<8x64xbf16> to vector<1x64xbf16>
    %c448 = arith.constant 448 : index
    %c0_61 = arith.constant 0 : index
    %135 = vector.load %arg11[%c448, %c0_61] : memref<512x32xbf16, #tpu.memory_space<vmem>>, vector<64x32xbf16>
    %cst_62 = arith.constant dense<0.000000e+00> : vector<1x32xf32>
    %136 = tpu.matmul %134, %135, %cst_62 {dimension_numbers = #tpu.dot_dimension_numbers<[1], [0], [0], [1], [0, 0, 1, 1], [], []>} : vector<1x64xbf16>, vector<64x32xbf16>, vector<1x32xf32> -> vector<1x32xf32>
    %137 = arith.addf %133, %136 : vector<1x32xf32>
    %c0_63 = arith.constant 0 : index
    %c0_64 = arith.constant 0 : index
    %138 = vector.load %arg12[%c0_63, %c0_64] : memref<1x32xf32, #tpu.memory_space<vmem>>, vector<1x32xf32>
    %139 = arith.addf %137, %138 : vector<1x32xf32>
    %140 = arith.mulf %139, %139 : vector<1x32xf32>
    %cst_65 = arith.constant dense<0.000000e+00> : vector<1xf32>
    %141 = vector.multi_reduction <add>, %140, %cst_65 [1] : vector<1x32xf32> to vector<1xf32>
    %142 = vector.shape_cast %141 : vector<1xf32> to vector<1x1xf32>
    %cst_66 = arith.constant 9.99999996E-13 : f32
    %143 = vector.broadcast %cst_66 : f32 to vector<1x1xf32>
    %144 = arith.addf %142, %143 : vector<1x1xf32>
    %145 = math.rsqrt %144 : vector<1x1xf32>
    %146 = vector.broadcast %145 : vector<1x1xf32> to vector<1x32xf32>
    %147 = arith.mulf %139, %146 : vector<1x32xf32>
    %148 = arith.truncf %147 : vector<1x32xf32> to vector<1x32xbf16>
    %c0_67 = arith.constant 0 : index
    %c0_68 = arith.constant 0 : index
    %149 = vector.load %arg13[%c0_67, %c0_68] : memref<32x10xbf16, #tpu.memory_space<vmem>>, vector<32x10xbf16>
    %cst_69 = arith.constant dense<0.000000e+00> : vector<1x10xf32>
    %150 = tpu.matmul %148, %149, %cst_69 {dimension_numbers = #tpu.dot_dimension_numbers<[1], [0], [0], [1], [0, 0, 1, 1], [], []>} : vector<1x32xbf16>, vector<32x10xbf16>, vector<1x10xf32> -> vector<1x10xf32>
    %c0_70 = arith.constant 0 : index
    %c0_71 = arith.constant 0 : index
    %151 = vector.load %arg14[%c0_70, %c0_71] : memref<1x10xf32, #tpu.memory_space<vmem>>, vector<1x10xf32>
    %152 = arith.addf %150, %151 : vector<1x10xf32>
    %cst_72 = arith.constant dense<0xFF800000> : vector<1xf32>
    %153 = vector.multi_reduction <maximumf>, %152, %cst_72 [1] : vector<1x10xf32> to vector<1xf32>
    %154 = vector.shape_cast %153 : vector<1xf32> to vector<1x1xf32>
    %155 = vector.broadcast %154 : vector<1x1xf32> to vector<1x10xf32>
    %156 = arith.subf %152, %155 : vector<1x10xf32>
    %157 = math.exp %156 : vector<1x10xf32>
    %cst_73 = arith.constant dense<0.000000e+00> : vector<1xf32>
    %158 = vector.multi_reduction <add>, %157, %cst_73 [1] : vector<1x10xf32> to vector<1xf32>
    %159 = vector.shape_cast %158 : vector<1xf32> to vector<1x1xf32>
    %160 = math.log %159 : vector<1x1xf32>
    %161 = vector.broadcast %160 : vector<1x1xf32> to vector<1x10xf32>
    %162 = arith.subf %156, %161 : vector<1x10xf32>
    %c0_74 = arith.constant 0 : index
    %c0_75 = arith.constant 0 : index
    %c0_76 = arith.constant 0 : index
    %163 = vector.load %arg15[%c0_74, %c0_75, %c0_76] : memref<1x1x10xf32, #tpu.memory_space<vmem>>, vector<1x1x10xf32>
    %164 = vector.shape_cast %163 : vector<1x1x10xf32> to vector<1x10xf32>
    %165 = vector.shape_cast %162 : vector<1x10xf32> to vector<1x1x10xf32>
    tpu.vector_store %arg15[%c0_74, %c0_75, %c0_76], %165 {strides = array<i32>} : memref<1x1x10xf32, #tpu.memory_space<vmem>>, vector<1x1x10xf32>,
    return
  }
  func.func @transform_0(%arg0: i32) -> (i32, i32, i32) {
    %c0_i32 = arith.constant 0 : i32
    %c0_i32_0 = arith.constant 0 : i32
    %c0_i32_1 = arith.constant 0 : i32
    return %arg0, %c0_i32, %c0_i32_0 : i32, i32, i32
  }
  func.func @transform_1(%arg0: i32) -> (i32, i32) {
    %c0_i32 = arith.constant 0 : i32
    %c0_i32_0 = arith.constant 0 : i32
    %c0_i32_1 = arith.constant 0 : i32
    return %c0_i32, %c0_i32_0 : i32, i32
  }
  func.func @transform_2(%arg0: i32) -> (i32, i32) {
    %c0_i32 = arith.constant 0 : i32
    %c0_i32_0 = arith.constant 0 : i32
    %c0_i32_1 = arith.constant 0 : i32
    return %c0_i32, %c0_i32_0 : i32, i32
  }
  func.func @transform_3(%arg0: i32) -> (i32, i32) {
    %c0_i32 = arith.constant 0 : i32
    %c0_i32_0 = arith.constant 0 : i32
    %c0_i32_1 = arith.constant 0 : i32
    return %c0_i32, %c0_i32_0 : i32, i32
  }
  func.func @transform_4(%arg0: i32) -> (i32, i32) {
    %c0_i32 = arith.constant 0 : i32
    %c0_i32_0 = arith.constant 0 : i32
    %c0_i32_1 = arith.constant 0 : i32
    return %c0_i32, %c0_i32_0 : i32, i32
  }
  func.func @transform_5(%arg0: i32) -> (i32, i32) {
    %c0_i32 = arith.constant 0 : i32
    %c0_i32_0 = arith.constant 0 : i32
    %c0_i32_1 = arith.constant 0 : i32
    return %c0_i32, %c0_i32_0 : i32, i32
  }
  func.func @transform_6(%arg0: i32) -> (i32, i32) {
    %c0_i32 = arith.constant 0 : i32
    %c0_i32_0 = arith.constant 0 : i32
    %c0_i32_1 = arith.constant 0 : i32
    return %c0_i32, %c0_i32_0 : i32, i32
  }
  func.func @transform_7(%arg0: i32) -> (i32, i32) {
    %c0_i32 = arith.constant 0 : i32
    %c0_i32_0 = arith.constant 0 : i32
    %c0_i32_1 = arith.constant 0 : i32
    return %c0_i32, %c0_i32_0 : i32, i32
  }
  func.func @transform_8(%arg0: i32) -> (i32, i32) {
    %c0_i32 = arith.constant 0 : i32
    %c0_i32_0 = arith.constant 0 : i32
    %c0_i32_1 = arith.constant 0 : i32
    return %c0_i32, %c0_i32_0 : i32, i32
  }
  func.func @transform_9(%arg0: i32) -> (i32, i32) {
    %c0_i32 = arith.constant 0 : i32
    %c0_i32_0 = arith.constant 0 : i32
    %c0_i32_1 = arith.constant 0 : i32
    return %c0_i32, %c0_i32_0 : i32, i32
  }
  func.func @transform_10(%arg0: i32) -> (i32, i32) {
    %c0_i32 = arith.constant 0 : i32
    %c0_i32_0 = arith.constant 0 : i32
    %c0_i32_1 = arith.constant 0 : i32
    return %c0_i32, %c0_i32_0 : i32, i32
  }
  func.func @transform_11(%arg0: i32) -> (i32, i32) {
    %c0_i32 = arith.constant 0 : i32
    %c0_i32_0 = arith.constant 0 : i32
    %c0_i32_1 = arith.constant 0 : i32
    return %c0_i32, %c0_i32_0 : i32, i32
  }
  func.func @transform_12(%arg0: i32) -> (i32, i32) {
    %c0_i32 = arith.constant 0 : i32
    %c0_i32_0 = arith.constant 0 : i32
    %c0_i32_1 = arith.constant 0 : i32
    return %c0_i32, %c0_i32_0 : i32, i32
  }
  func.func @transform_13(%arg0: i32) -> (i32, i32) {
    %c0_i32 = arith.constant 0 : i32
    %c0_i32_0 = arith.constant 0 : i32
    %c0_i32_1 = arith.constant 0 : i32
    return %c0_i32, %c0_i32_0 : i32, i32
  }
  func.func @transform_14(%arg0: i32) -> (i32, i32, i32) {
    %c0_i32 = arith.constant 0 : i32
    %c0_i32_0 = arith.constant 0 : i32
    %c0_i32_1 = arith.constant 0 : i32
    return %arg0, %c0_i32, %c0_i32_0 : i32, i32, i32
  }
}

</mosaic_0001>

<bundles_post_ra>
// kernel: _lambda_.1
= control target key start
LH: loop header
LB: loop body
LE: loop exit
PB: predicated region body
PF: predicated region fallthrough
CT: control target
= control target key end

     0   :  { %s3652_s0 = inlined_call_operand.hbm [shape: f32[2,16,16], index: 0, kind: input, shape index: {}]   ;;  %s3653_s1 = inlined_call_operand.vmem [shape: bf16[54,64], index: 1, kind: input, shape index: {}]   ;;  %s3654_s2 = inlined_call_operand.hbm [shape: f32[1,64], index: 2, kind: input, shape index: {}]   ;;  %s3655_s3 = inlined_call_operand.vmem [shape: f32[1,64], index: 3, kind: input, shape index: {}, may-alias: {3,6,9}]   ;;  %s3656_s4 = inlined_call_operand.hbm [shape: bf16[240,64], index: 4, kind: input, shape index: {}]   ;;  %s3657_s5 = inlined_call_operand.hbm [shape: f32[1,64], index: 5, kind: input, shape index: {}]   ;;  %s3658_s6 = inlined_call_operand.vmem [shape: f32[1,64], index: 6, kind: input, shape index: {}, may-alias: {3,6,9}]   ;;  %s3659_s7 = inlined_call_operand.hbm [shape: bf16[240,64], index: 7, kind: input, shape index: {}]   ;;  %s3660_s8 = inlined_call_operand.hbm [shape: f32[1,64], index: 8, kind: input, shape index: {}]   ;;  %s3661_s9 = inlined_call_operand.vmem [shape: f32[1,64], index: 9, kind: input, shape index: {}, may-alias: {3,6,9}]   ;;  %s3662_s10 = inlined_call_operand.hbm [shape: bf16[512,32], index: 10, kind: input, shape index: {}]   ;;  %s3663_s11 = inlined_call_operand.hbm [shape: f32[1,32], index: 11, kind: input, shape index: {}]   ;;  %s3664_s12 = inlined_call_operand.vmem [shape: bf16[32,10], index: 12, kind: input, shape index: {}]   ;;  %s3665_s13 = inlined_call_operand.vmem [shape: f32[1,10], index: 13, kind: input, shape index: {}]   ;;  %s3666_s14 = inlined_call_operand.hbm [shape: f32[2,1,10], index: 14, kind: output, shape index: {}]  }
   0x1   :  { %3672 = sst [smem:[#allocation23_spill]] %s3654_s2 }
   0x2   :  { %3673 = sst [smem:[#allocation24_spill]] %s3658_s6 }
   0x3   :  { %3674 = sst [smem:[#allocation25_spill]] %s3661_s9 }
   0x4   :  { %3675 = sst [smem:[#allocation26_spill]] %s3664_s12 }
   0x5   :  { %3676 = sst [smem:[#allocation27_spill]] %s3665_s13 }
   0x6   :  { %3677 = sst [smem:[#allocation28_spill]] %s3666_s14 }
   0x7   :  { %19 = vsyncpa [#allocation3], 0 }
   0x8   :  { %21 = vsyncpa [#allocation3 + $0x1], 0 }
   0x9   :  { %22 = vsyncpa [#allocation6], 0 }
   0xa   :  { %23 = vsyncpa [#allocation9], 0 }
   0xb   :  { %24 = vsyncpa [#allocation12], 0 }
   0xc   :  { %25 = vsyncpa [#allocation15], 0 }
   0xd   :  { %26 = vsyncpa [#allocation4], 0 }
   0xe   :  { %28 = vsyncpa [#allocation4 + $0x1], 0  ;;  %s3086_s29 = smov 0   ;;  %s3088_s30 = smov 0  }
   0xf   :  { %s3090_s15 = smov 0   ;;  %s3092_s16 = smov 0  }
  0x10 LB: > { %s2988_s17 = smov [#allocation5]   ;;  %s3107_s19 = sadd.s32 4294967295, %s2986_s16   ;;  %s2986_s16 = sphi %s3092_s16, %s3709_s16   ;;  %s2982_s15 = sphi %s3090_s15, %s3708_s15   ;;  %s2978_s30 = sphi %s3088_s30, %s3707_s30   ;;  %s2974_s29 = sphi %s3086_s29, %s3706_s29  }
  0x11   : > { %s380_s18 = sshll.u32 %s2988_s17, 4  ;;  %p2143_p0 = scmp.ge.s32.totalorder %s2986_s16, 1  ;;  %s3112_s18 = int_to_ptr.vmem [resolvable:$true] %s380_s18 }
  0x12   : > { %p3669_p1 = scmp.eq.s32.totalorder %s3107_s19, 0  ;;  %p364_p2 = scmp.lt.s32.totalorder %s2986_s16, 3 }
  0x13   : > { %s2989_s21 = smov [#allocation8]   ;;  %s2990_s23 = smov [#allocation11]  }
  0x14   : > { %p3114_p3 = pnand %p2143_p0, %p364_p2  ;;  %s407_s22 = sshll.u32 %s2989_s21, 4  ;;  %s3121_s22 = int_to_ptr.vmem [resolvable:$true] %s407_s22 }
  0x15   : > { %s434_s24 = sshll.u32 %s2990_s23, 4  ;;  %s2991_s26 = smov [#allocation7]   ;;  %s3129_s24 = int_to_ptr.vmem [resolvable:$true] %s434_s24 }
  0x16   : > { %s3678_s20 = scalar_select %p3114_p3, 1, 0 }
  0x17   : > { %p2500_p5 = pneg %p3114_p3  ;;  %s3131_s27 = sshll.u32 %s2991_s26, 4  ;;  %s394_s27 = int_to_ptr.vmem [resolvable:$true] %s3131_s27 }
  0x18   : > { %s3680_s2 = sld [smem:[#allocation23_spill]] }
  0x19   : > { %p3125_p6 = pnand %p2500_p5, %p3669_p1 }
  0x1b   : > { %p3141_p8 = pneg %p3125_p6 }
  0x1e   : > { %s2678_s14 = scalar_lea.hbm %s3680_s2, 16 }
  0x1f   : > { %p2679_p7 = scmp.ne.s32.totalorder %s3680_s2, %s2678_s14  ;;  %p2685_p11 = scmp.lt.u32.totalorder %s2678_s14, %s3680_s2 }
  0x21   : > { %p2681_p9 = pnand %p3141_p8, %p2679_p7 }
  0x23   : > { %p2682_p10 = pneg %p2681_p9 }
  0x25   : > { %p2687_p12 = pnand %p2685_p11, %p2682_p10 }
  0x27   : > { %2690 = shalt.err (!%p2687_p12)
}
  0x28   : > { %s2691_s13 = scalar_lea.vmem %s3112_s18, 16  ;;  %s2698_s28 = scalar_lea.vmem %s3112_s18, 32 }
  0x29   : > { %p2692_p13 = scmp.ne.s32.totalorder %s3112_s18, %s2691_s13  ;;  %p2699_p5 = scmp.lt.s32.totalorder %s3112_s18, %s3112_s18 }
  0x2a   : > { %p2700_p7 = scmp.lt.s32.totalorder %s2698_s28, %s2691_s13 }
  0x2b   : > { %p2694_p0 = pnand %p2692_p13, %p3141_p8 }
  0x2c   : > { %p2701_p9 = por %p2700_p7, %p2699_p5 }
  0x2d   : > { %p2695_p2 = pneg %p2694_p0 }
  0x2f   : > { %p2702_p4 = pnand %p2701_p9, %p2695_p2 }
  0x31   : > { %2705 = shalt.err (!%p2702_p4)
}
  0x32   : > { %2503 = dma.hbm_to_vmem [thread:$0]  (!%p3125_p6), %s3680_s2, 16, %s3112_s18, [#allocation6]  }
  0x33   : > { %s2706_s26 = scalar_lea.hbm %s3657_s5, 16 }
  0x34   : > { %p2707_p10 = scmp.ne.s32.totalorder %s3657_s5, %s2706_s26  ;;  %p2713_p4 = scmp.lt.u32.totalorder %s2706_s26, %s3657_s5 }
  0x36   : > { %p2709_p11 = pnand %p2707_p10, %p3141_p8 }
  0x38   : > { %p2710_p12 = pneg %p2709_p11 }
  0x3a   : > { %p2715_p13 = pnand %p2713_p4, %p2710_p12 }
  0x3c   : > { %2718 = shalt.err (!%p2715_p13)
}
  0x3d   : > { %s2719_s18 = scalar_lea.vmem %s3121_s22, 16  ;;  %s2726_s6 = scalar_lea.vmem %s3121_s22, 32 }
  0x3e   : > { %p2720_p0 = scmp.ne.s32.totalorder %s3121_s22, %s2719_s18  ;;  %p2727_p7 = scmp.lt.s32.totalorder %s3121_s22, %s3121_s22 }
  0x3f   : > { %p2728_p9 = scmp.lt.s32.totalorder %s2726_s6, %s2719_s18 }
  0x40   : > { %p2722_p2 = pnand %p2720_p0, %p3141_p8 }
  0x41   : > { %p2729_p10 = por %p2728_p9, %p2727_p7 }
  0x42   : > { %p2723_p5 = pneg %p2722_p2 }
  0x44   : > { %p2730_p11 = pnand %p2729_p10, %p2723_p5 }
  0x46   : > { %2733 = shalt.err (!%p2730_p11)
}
  0x47   : > { %2509 = dma.hbm_to_vmem [thread:$0]  (!%p3125_p6), %s3657_s5, 16, %s3121_s22, [#allocation9]  }
  0x48   : > { %s2734_s21 = scalar_lea.hbm %s3660_s8, 16 }
  0x49   : > { %p2735_p12 = scmp.ne.s32.totalorder %s3660_s8, %s2734_s21  ;;  %p2741_p0 = scmp.lt.u32.totalorder %s2734_s21, %s3660_s8 }
  0x4b   : > { %p2737_p4 = pnand %p2735_p12, %p3141_p8 }
  0x4d   : > { %p2738_p13 = pneg %p2737_p4 }
  0x4f   : > { %p2743_p2 = pnand %p2741_p0, %p2738_p13 }
  0x51   : > { %2746 = shalt.err (!%p2743_p2)
}
  0x52   : > { %s2747_s22 = scalar_lea.vmem %s3129_s24, 16  ;;  %s2754_s6 = scalar_lea.vmem %s3129_s24, 32 }
  0x53   : > { %p2748_p5 = scmp.ne.s32.totalorder %s3129_s24, %s2747_s22  ;;  %p2755_p10 = scmp.lt.s32.totalorder %s3129_s24, %s3129_s24 }
  0x54   : > { %p2756_p11 = scmp.lt.s32.totalorder %s2754_s6, %s2747_s22 }
  0x55   : > { %p2750_p7 = pnand %p2748_p5, %p3141_p8 }
  0x56   : > { %p2757_p12 = por %p2756_p11, %p2755_p10 }
  0x57   : > { %p2751_p9 = pneg %p2750_p7 }
  0x59   : > { %p2758_p4 = pnand %p2757_p12, %p2751_p9 }
  0x5b   : > { %2761 = shalt.err (!%p2758_p4)
}
  0x5c   : > { %2515 = dma.hbm_to_vmem [thread:$0]  (!%p3125_p6), %s3660_s8, 16, %s3129_s24, [#allocation12]  }
  0x5d   : > { %s2762_s21 = scalar_lea.hbm %s3656_s4, 1920 }
  0x5e   : > { %p2763_p13 = scmp.ne.s32.totalorder %s3656_s4, %s2762_s21  ;;  %p2769_p5 = scmp.lt.u32.totalorder %s2762_s21, %s3656_s4 }
  0x60   : > { %p2765_p0 = pnand %p2763_p13, %p3141_p8 }
  0x62   : > { %p2766_p2 = pneg %p2765_p0 }
  0x64   : > { %p2771_p7 = pnand %p2769_p5, %p2766_p2 }
  0x66   : > { %2774 = shalt.err (!%p2771_p7)
}
  0x67   : > { %s2775_s22 = scalar_lea.vmem %s394_s27, 1920  ;;  %p2783_p12 = scmp.lt.s32.totalorder %s394_s27, %s394_s27 }
  0x68   : > { %p2776_p9 = scmp.ne.s32.totalorder %s394_s27, %s2775_s22  ;;  %p2784_p4 = scmp.lt.s32.totalorder %s2775_s22, %s2775_s22 }
  0x6a   : > { %p2778_p10 = pnand %p2776_p9, %p3141_p8  ;;  %p2785_p1 = por %p2784_p4, %p2783_p12 }
  0x6c   : > { %p2779_p11 = pneg %p2778_p10 }
  0x6e   : > { %p2786_p3 = pnand %p2785_p1, %p2779_p11 }
  0x70   : > { %2789 = shalt.err (!%p2786_p3)
}
  0x71   : > { %s2992_s24 = smov 64   ;;  %s2993_s6 = smov 4  }
  0x72   : > { %2506 = dma.hbm_to_vmem [thread:$0]  (!%p3125_p6), %s3656_s4, 1920, %s394_s27, [#allocation6], %s2992_s24, %s2992_s24, %s2993_s6  }
  0x73   : > { %s2994_s14 = smov [#allocation10]   ;;  %s2995_s21 = smov [#allocation13]  }
  0x74   : > { %s420_s17 = sshll.u32 %s2994_s14, 4  ;;  %s447_s26 = sshll.u32 %s2995_s21, 4  ;;  %s421_s17 = int_to_ptr.vmem [resolvable:$true] %s420_s17  ;;  %s3233_s26 = int_to_ptr.vmem [resolvable:$true] %s447_s26 }
  0x75   : > { %s2790_s18 = scalar_lea.hbm %s3659_s7, 1920 }
  0x76   : > { %p2791_p1 = scmp.ne.s32.totalorder %s3659_s7, %s2790_s18  ;;  %p2797_p0 = scmp.lt.u32.totalorder %s2790_s18, %s3659_s7 }
  0x78   : > { %p2793_p3 = pnand %p2791_p1, %p3141_p8 }
  0x7a   : > { %p2794_p13 = pneg %p2793_p3 }
  0x7c   : > { %p2799_p2 = pnand %p2797_p0, %p2794_p13 }
  0x7e   : > { %2802 = shalt.err (!%p2799_p2)
}
  0x7f   : > { %s2803_s12 = scalar_lea.vmem %s421_s17, 1920  ;;  %p2811_p10 = scmp.lt.s32.totalorder %s421_s17, %s421_s17 }
  0x80   : > { %p2804_p5 = scmp.ne.s32.totalorder %s421_s17, %s2803_s12  ;;  %p2812_p11 = scmp.lt.s32.totalorder %s2803_s12, %s2803_s12 }
  0x82   : > { %p2806_p7 = pnand %p2804_p5, %p3141_p8  ;;  %p2813_p12 = por %p2812_p11, %p2811_p10 }
  0x84   : > { %p2807_p9 = pneg %p2806_p7 }
  0x86   : > { %p2814_p4 = pnand %p2813_p12, %p2807_p9 }
  0x88   : > { %2817 = shalt.err (!%p2814_p4)
}
  0x89   : > { %2512 = dma.hbm_to_vmem [thread:$0]  (!%p3125_p6), %s3659_s7, 1920, %s421_s17, [#allocation9], %s2992_s24, %s2992_s24, %s2993_s6  }
  0x8a   : > { %s2818_s28 = scalar_lea.hbm %s3662_s10, 4096 }
  0x8b   : > { %p2819_p1 = scmp.ne.s32.totalorder %s3662_s10, %s2818_s28  ;;  %p2825_p0 = scmp.lt.u32.totalorder %s2818_s28, %s3662_s10 }
  0x8d   : > { %p2821_p3 = pnand %p2819_p1, %p3141_p8 }
  0x8f   : > { %p2822_p13 = pneg %p2821_p3 }
  0x91   : > { %p2827_p2 = pnand %p2825_p0, %p2822_p13 }
  0x93   : > { %2830 = shalt.err (!%p2827_p2)
}
  0x94   : > { %s2831_s17 = scalar_lea.vmem %s3233_s26, 4096  ;;  %p2839_p10 = scmp.lt.s32.totalorder %s3233_s26, %s3233_s26 }
  0x95   : > { %p2832_p5 = scmp.ne.s32.totalorder %s3233_s26, %s2831_s17  ;;  %p2840_p11 = scmp.lt.s32.totalorder %s2831_s17, %s2831_s17 }
  0x97   : > { %p2834_p7 = pnand %p2832_p5, %p3141_p8  ;;  %p2841_p12 = por %p2840_p11, %p2839_p10 }
  0x99   : > { %p2835_p9 = pneg %p2834_p7 }
  0x9b   : > { %p2842_p4 = pnand %p2841_p12, %p2835_p9 }
  0x9d   : > { %2845 = shalt.err (!%p2842_p4)
}
  0x9e   : > { %2518 = dma.hbm_to_vmem [thread:$0]  (!%p3125_p6), %s3662_s10, 4096, %s3233_s26, [#allocation12], %s2992_s24, %s2992_s24, %s2993_s6  }
  0x9f   : > { %s2996_s14 = smov [#allocation14]   ;;  %s2846_s18 = scalar_lea.hbm %s3663_s11, 16 }
  0xa0   : > { %s461_s21 = sshll.u32 %s2996_s14, 4  ;;  %p2847_p1 = scmp.ne.s32.totalorder %s3663_s11, %s2846_s18  ;;  %s462_s21 = int_to_ptr.vmem [resolvable:$true] %s461_s21 }
  0xa1   : > { %p2853_p0 = scmp.lt.u32.totalorder %s2846_s18, %s3663_s11 }
  0xa2   : > { %p2849_p3 = pnand %p2847_p1, %p3141_p8 }
  0xa4   : > { %p2850_p13 = pneg %p2849_p3 }
  0xa6   : > { %p2855_p2 = pnand %p2853_p0, %p2850_p13 }
  0xa8   : > { %2858 = shalt.err (!%p2855_p2)
}
  0xa9   : > { %s2859_s24 = scalar_lea.vmem %s462_s21, 16  ;;  %s2866_s6 = scalar_lea.vmem %s462_s21, 32 }
  0xaa   : > { %p2860_p5 = scmp.ne.s32.totalorder %s462_s21, %s2859_s24  ;;  %p2867_p10 = scmp.lt.s32.totalorder %s462_s21, %s462_s21 }
  0xab   : > { %p2868_p11 = scmp.lt.s32.totalorder %s2866_s6, %s2859_s24 }
  0xac   : > { %p2862_p7 = pnand %p2860_p5, %p3141_p8 }
  0xad   : > { %p2869_p12 = por %p2868_p11, %p2867_p10 }
  0xae   : > { %p2863_p9 = pneg %p2862_p7 }
  0xb0   : > { %p2870_p4 = pnand %p2869_p12, %p2863_p9 }
  0xb2   : > { %2873 = shalt.err (!%p2870_p4)
}
  0xb3   : > { %2521 = dma.hbm_to_vmem [thread:$0]  (!%p3125_p6), %s3663_s11, 16, %s462_s21, [#allocation15]  }
  0xb4   : > { %s2142_s23 = sadd.s32 4294967294, %s2986_s16   ;;  %s3302_s25 = sadd.s32 1, %s2986_s16  }
  0xb5   : > { %s41_s2 = sadd.s32 1, %s2982_s15  ;;  %s38_s14 = ssub.s32 %s2986_s16, %s3302_s25 }
  0xb6   : > { %p48_p8 = scmp.ne.s32.totalorder %s2982_s15, %s2978_s30  ;;  %p39_p1 = scmp.eq.s32.totalorder %s38_s14, 0 }
  0xb7   : > { %p49_p3 = scmp.eq.s32.totalorder %s2986_s16, 0  ;;  %p54_p13 = scmp.ne.s32.totalorder %s2978_s30, %s2974_s29 }
  0xb8   : > { %p351_p0 = scmp.eq.s32.totalorder %s3107_s19, 1  ;;  %p3682_p5 = scmp.eq.s32.totalorder %s3107_s19, 0 }
  0xb9   : > { %s3314_s13 = scalar_select %p39_p1, %s2982_s15, %s41_s2  }
  0xba   : > { %p50_p2 = por %p49_p3, %p48_p8  ;;  %p3318_p7 = por %p3682_p5, %p54_p13 }
  0xbb   : > { %p3322_p6 = por %p351_p0, %p48_p8  ;;  %p357_p9 = scmp.eq.s32.totalorder %s2142_s23, 1 }
  0xbc   : > { %p2537_p10 = scmp.lt.s32.totalorder %s2986_s16, 2  ;;  %s478_s18 = sand.u32 1, %s2982_s15  }
  0xbd   : > { %s3684_s21 = scalar_select %p3322_p6, 1, 0 }
  0xbe   : > { %p3328_p11 = por %p357_p9, %p54_p13  ;;  %s2152_s9 = sshll.u32 %s478_s18, 4 }
  0xbf   : > { %s2270_s27 = sshll.u32 %s2986_s16, 8  ;;  %s482_s26 = scalar_lea.vmem [#allocation2], %s2152_s9 }
  0xc0   : > { %s3685_s22 = scalar_select %p3328_p11, 1, 0 }
  0xc1   : > { %s3336_s6 = scalar_lea.hbm %s3652_s0, %s2270_s27  ;;  %s489_s12 = sshll.u32 %s482_s26, 4  ;;  %s3342_s12 = int_to_ptr.vmem [resolvable:$true] %s489_s12 }
  0xc2   : > { %p3338_p12 = pnand %p2537_p10, %p50_p2  ;;  %s3344_s2 = scalar_lea.sflag [#allocation3], %s478_s18 }
  0xc3   : > { %s2874_s14 = scalar_lea.hbm %s3336_s6, 256  ;;  %s2879_s17 = scalar_lea.hbm %s3652_s0, 512 }
  0xc4   : > { %p2875_p4 = scmp.ne.s32.totalorder %s3336_s6, %s2874_s14  ;;  %p2876_p8 = pneg %p3338_p12 }
  0xc5   : > { %p2880_p13 = scmp.lt.u32.totalorder %s3336_s6, %s3652_s0  ;;  %p2881_p0 = scmp.lt.u32.totalorder %s2879_s17, %s2874_s14 }
  0xc6   : > { %p2877_p1 = pnand %p2876_p8, %p2875_p4  ;;  %p2883_p5 = scmp.lt.u32.totalorder %s2874_s14, %s3336_s6 }
  0xc7   : > { %p2882_p2 = por %p2881_p0, %p2880_p13 }
  0xc8   : > { %p2878_p3 = pneg %p2877_p1 }
  0xc9   : > { %p2884_p9 = por %p2883_p5, %p2882_p2 }
  0xcb   : > { %p2885_p10 = pnand %p2884_p9, %p2878_p3 }
  0xcd   : > { %2888 = shalt.err (!%p2885_p10)
}
  0xce   : > { %s2889_s18 = scalar_lea.vmem %s3342_s12, 256  ;;  %s2997_s9 = smov [#allocation2]  }
  0xcf   : > { %p2890_p4 = scmp.ne.s32.totalorder %s3342_s12, %s2889_s18  ;;  %s2894_s27 = sshll.u32 %s2997_s9, 4  ;;  %s2895_s27 = int_to_ptr.vmem [resolvable:$false] %s2894_s27 }
  0xd0   : > { %s2896_s24 = scalar_lea.vmem %s2895_s27, 512  ;;  %p2897_p6 = scmp.lt.s32.totalorder %s3342_s12, %s2895_s27 }
  0xd1   : > { %p2892_p1 = pnand %p2890_p4, %p2876_p8  ;;  %p2898_p13 = scmp.lt.s32.totalorder %s2896_s24, %s2889_s18 }
  0xd3   : > { %p2893_p11 = pneg %p2892_p1  ;;  %p2899_p0 = por %p2898_p13, %p2897_p6 }
  0xd5   : > { %p2900_p2 = pnand %p2899_p0, %p2893_p11 }
  0xd7   : > { %2903 = shalt.err (!%p2900_p2)
}
  0xd8   : > { %s2998_s14 = smov 128   ;;  %s2999_s17 = smov 8  }
  0xd9   : > { %2525 = dma.hbm_to_vmem [thread:$0]  (!%p3338_p12), %s3336_s6, 256, %s3342_s12, %s3344_s2, %s2998_s14, %s2998_s14, %s2999_s17  }
  0xda   : > { %p3687_p8 = scmp.ne.s32.totalorder %s3678_s20, 0 }
  0xdb   : > { %s3375_s26 = sand.u32 (!%p3687_p8), 1, %s2978_s30  }
  0xdc   : > { %501 = sbr.rel (%p3687_p8) target bundleno = 2838 (0xb16), region = 76  ;;  %s2156_s18 = sshll.u32 (!%p3687_p8), %s3375_s26, 4 }
  0xdd   : > { %s504_s9 = scalar_lea.sflag (!%p3687_p8), [#allocation3], %s3375_s26  ;;  %s507_s27 = scalar_lea.vmem (!%p3687_p8), [#allocation2], %s2156_s18 }
  0xe3   : > { %2949 = dma.done.wait (%p3318_p7), %s504_s9, 256  }
  0xe4   : > { %2951 = vsyncadd (%p3318_p7), %s504_s9, 4294967040  ;;  %p3688_p6 = scmp.eq.s32.totalorder %s3107_s19, 0 }
  0xe6   : > { %2953 = dma.done.wait (%p3688_p6), [#allocation6], 1936   ;;  %p3689_p11 = pmov %p3688_p6 }
  0xe7   : > { %p3690_p12 = pmov %p3688_p6 }
  0xe8   : > { %2955 = vsyncadd (%p3689_p11), [#allocation6], 4294965360 }
  0xe9   : > { %2957 = dma.done.wait (%p3690_p12), [#allocation9], 1936   ;;  %p3691_p3 = pmov %p3688_p6 }
  0xeb   : > { %2959 = vsyncadd (%p3691_p3), [#allocation9], 4294965360  ;;  %p3692_p5 = pmov %p3691_p3 }
  0xec   : > { %p3693_p9 = pmov %p3691_p3 }
  0xed   : > { %2961 = dma.done.wait (%p3692_p5), [#allocation12], 4112  }
  0xee   : > { %2963 = vsyncadd (%p3693_p9), [#allocation12], 4294963184  ;;  %p3694_p7 = pmov %p3691_p3 }
  0xef   : > { %p3695_p10 = pmov %p3691_p3 }
  0xf0   : > { %2965 = dma.done.wait (%p3694_p7), [#allocation15], 16  }
  0xf1   : > { %2967 = vsyncadd (%p3695_p10), [#allocation15], 4294967280  ;;  %v3000_v0 = vmov 0.0   ;;  %v580_v1 = vld [vmem:[%s507_s27] sm:$0xff]  ;;  %v581_v2 = vld [vmem:[%s507_s27 + $0x8] sm:$0xff]  ;;  %s3001_s20 = smov 1   ;;  %v613_v8 = vlaneseq }
  0xf2   : > { %2328 = vmatprep.subr.bf16.mxu0 %v3000_v0  ;;  %2336 = vmatprep.subr.bf16.mxu1 %v3000_v0  ;;  %v2164_v3 = vadd.f32 -0.45, %v580_v1  ;;  %v2165_v4 = vadd.f32 -0.45, %v581_v2  ;;  %vm3002_vm0 = vmmov 0   ;;  %vm594_vm1 = vcmask 7168  }
  0xf3   : > { %2332 = vmatprep.mubr.msk.bf16.mxu0 %vm3002_vm0, %v3000_v0  ;;  %2340 = vmatprep.mubr.msk.bf16.mxu1 %vm3002_vm0, %v3000_v0  ;;  %v616_v9 = vshrl.u32 %v613_v8, 7  ;;  %vm597_vm2 = vcmask 138240   ;;  %vm602_vm3 = vcmask 1040384   ;;  %v614_v16 = vand.u32 127, %v613_v8  ;;  %v2604_v35 = vld [vmem:[%s3653_s1] sm:$0xff]   ;;  %v2605_v36 = vld [vmem:[%s3653_s1 + $0x8] sm:$0xff]  }
  0xf4   : > { %v584_v5 = vmul.f32 4.5454545, %v2164_v3  ;;  %v585_v6 = vmul.f32 4.5454545, %v2165_v4  ;;  %vm2166_vm4 = vmneg %vm602_vm3  ;;  %vm3003_vm5 = vmmov 1   ;;  %vm621_vm9 = vcmask 146432  }
  0xf5   : > { %v617_v10 = vmul.u32 2, %v616_v9  ;;  %vm3407_vm6 = vmpackc.low %vm3003_vm5, %vm2166_vm4  ;;  %v2606_v37 = vld [vmem:[%s3653_s1 + $0x10] sm:$0xff]   ;;  %v2607_v38 = vld [vmem:[%s3653_s1 + $0x18] ss:$0 sps:$4 sm:$0x77]   ;;  %vm815_vm11 = vcmask 1042432  }
  0xf6   : > { %v2599_v7 = vpack.i.bf16 %v585_v6, %v584_v5  ;;  %v817_v39 = vsel %vm815_vm11, %v2607_v38, 0  ;;  %s3004_s18 = smov 18   ;;  %s3005_s9 = smov 36   ;;  %vm774_vm12 = vcmask 293888   ;;  %vm812_vm13 = vcmask 441344   ;;  %v2608_v5 = vld [vmem:[#allocation7] sm:$0xff]  }
  0xf7   : > { %v669_v17 = vadd.s32 1, %v617_v10  ;;  %vm618_vm7 = vcmp.eq.s32.totalorder %v614_v16, %v617_v10  ;;  %v717_v29 = vadd.s32 2, %v617_v10  ;;  %v2181_v59 = vld [vmem:[#allocation5] ss:$0 sm:$0xff]  ;;  %s3006_s28 = smov 8   ;;  %v3007_v6 = vmov 0  }
  0xf8   : > { %2600 = vrot.lane.b32.xlu0 %v2599_v7, %s3001_s20  ;;  %v619_v27 = vsel %vm618_vm7, 1.0, %v3000_v0  ;;  %v2187_v61 = vld [vmem:[%s3655_s3] ss:$0 sm:$0xff]  ;;  %v2609_v7 = vld [vmem:[#allocation7 + $0x8] sm:$0xff]   ;;  %v2610_v8 = vld [vmem:[#allocation7 + $0x10] sm:$0xff]   ;;  %vm873_vm15 = vcmask 64512  }
  0xf9   : > { %vm670_vm8 = vcmp.eq.s32.totalorder %v614_v16, %v669_v17  ;;  %v620_v31 = vpack.c.bf16 %v619_v27, %v619_v27  ;;  %vm718_vm10 = vcmp.eq.s32.totalorder %v614_v16, %v717_v29  ;;  %v2611_v9 = vld [vmem:[#allocation7 + $0x18] sm:$0xff]   ;;  %v2612_v10 = vld [vmem:[#allocation7 + $0x20] sm:$0xff]   ;;  %v2618_v16 = vld [vmem:[#allocation7 + $0x50] sm:$0xff]   ;;  %s3008_s6 = smov 32   ;;  %s3009_s12 = smov 80   ;;  %vm900_vm4 = vcmask 261120  }
  0xfa   : > { %v671_v28 = vsel %vm670_vm8, 1.0, %v3000_v0  ;;  %v719_v33 = vsel %vm718_vm10, 1.0, %v3000_v0  ;;  %v2619_v17 = vld [vmem:[#allocation7 + $0x58] sm:$0xff]   ;;  %vm1030_vm5 = vcmask 916480   ;;  %s3698_s24 = sld [smem:[#allocation24_spill]]  ;;  %vm1338_vm7 = vcmask 523264  }
  0xfb   : > { %v672_v32 = vpack.c.bf16 %v671_v28, %v671_v28  ;;  %v720_v34 = vpack.c.bf16 %v719_v33, %v719_v33  ;;  %s3700_s20 = sld [smem:[#allocation26_spill]]  ;;  %s3701_s2 = sld [smem:[#allocation27_spill]]  ;;  %vm1982_vm8 = vcmask 73728  }
  0xfc   : > { %s578_s14 = scalar_lea.vmem [#allocation16], %s3375_s26  ;;  %s3702_s27 = sld [smem:[#allocation28_spill]] }
  0xfd   : > { %s2009_s17 = sshll.u32 %s578_s14, 4  ;;  %p3703_p1 = scmp.ne.s32.totalorder %s3684_s21, 0  ;;  %s3609_s17 = int_to_ptr.vmem [resolvable:$true] %s2009_s17 }
 0x16a   : > { %v2601_v11 = vpop.permute.xlu0 %2600 }
 0x16b   : > { %v2603_v12 = vunpack.i.h.bf16 %v2601_v11  ;;  %v2602_v13 = vunpack.i.l.bf16 %v2601_v11  ;;  %v2613_v11 = vld [vmem:[#allocation7 + $0x28] sm:$0xff]  }
 0x16d   : > { %v596_v14 = vsel %vm594_vm1, 0.0, %v2603_v12  ;;  %v595_v15 = vsel %vm594_vm1, 0.0, %v2602_v13  ;;  %v2614_v12 = vld [vmem:[#allocation7 + $0x30] sm:$0xff]   ;;  %v2615_v13 = vld [vmem:[#allocation7 + $0x38] sm:$0xff]   ;;  %vm875_vm1 = vcmask 588800  }
 0x16e   : > { %v599_v18 = vsel %vm597_vm2, %v596_v14, 0.0  ;;  %v598_v19 = vsel %vm597_vm2, %v595_v15, 0.0  ;;  %v2616_v14 = vld [vmem:[#allocation7 + $0x40] sm:$0xff]   ;;  %v2617_v15 = vld [vmem:[#allocation7 + $0x48] sm:$0xff]   ;;  %vm896_vm2 = vcmask 654336  }
 0x16f   : > { %v604_v20 = vrot.slane %v599_v18, 7  ;;  %v603_v21 = vrot.slane %v598_v19, 7  ;;  %v2620_v18 = vld [vmem:[#allocation7 + $0x60] sm:$0xff]   ;;  %v2621_v19 = vld [vmem:[#allocation7 + $0x68] sm:$0xff]  }
 0x171   : > { %v605_v22 = vsel %vm602_vm3, %v603_v21, %v604_v20  ;;  %v610_v24 = vsel %vm602_vm3, %v604_v20, 0.0  ;;  %v2622_v20 = vld [vmem:[#allocation7 + $0x70] sm:$0xff]  }
 0x172   : > { %v2168_v25 = vpack.c.bf16 %v605_v22, %v603_v21  ;;  %v612_v26 = vpack.c.bf16 %v610_v24, %v610_v24 }
 0x174   : > { %2329 = vmatpush3.bf16.msk.msra.mxu0 %vm3407_vm6, %v2168_v25  ;;  %2337 = vmatpush3.bf16.msk.msra.mxu1 %vm3407_vm6, %v2168_v25  ;;  %v626_v30 = vsel %vm602_vm3, %v612_v26, 0 }
 0x175   : > { %2330 = vmatprep.subr.bf16.mxu0 %v3000_v0  ;;  %2338 = vmatprep.subr.bf16.mxu1 %v3000_v0 }
 0x178   : > { %2331 = vmatpush3.bf16.msra.mxu0 %v626_v30  ;;  %2339 = vmatpush3.bf16.msra.mxu1 %v626_v30 }
 0x179   : > { %2344 = vmatprep.subr.bf16.mxu0 %v3000_v0  ;;  %2352 = vmatprep.subr.bf16.mxu1 %v3000_v0 }
 0x17b   : > { %2333 = vmatmul.mubr.msk.bf16.vlgmr.msra.gmra.mrb[0].mxu0 %vm621_vm9, %v620_v31  ;;  %2341 = vmatmul.mubr.msk.bf16.vlgmr.msra.gmra.mrb[0].mxu1 %vm621_vm9, %v672_v32 }
 0x17c   : > { %2345 = vmatpush3.bf16.msk.msra.mxu0 %vm3407_vm6, %v2168_v25  ;;  %2348 = vmatprep.mubr.msk.bf16.mxu0 %vm3002_vm0, %v3000_v0 }
 0x17d   : > { %2346 = vmatprep.subr.bf16.mxu0 %v3000_v0  ;;  %2360 = vmatprep.mubr.msk.bf16.mxu1 %vm3002_vm0, %v3000_v0 }
 0x17e   : > { %2353 = vmatpush3.bf16.msra.mxu1 %v2604_v35 }
 0x17f   : > { %2354 = vmatprep.subr.bf16.mxu1 %v3000_v0 }
 0x180   : > { %2347 = vmatpush3.bf16.msra.mxu0 %v626_v30 }
 0x181   : > { %1033 = vmatprep.subr.bf16.mxu0 %v3007_v6 }
 0x182   : > { %2355 = vmatpush3.bf16.msra.mxu1 %v2605_v36 }
 0x183   : > { %2349 = vmatmul.mubr.msk.bf16.vlgmr.msra.gmra.mrb[4].mxu0 %vm621_vm9, %v720_v34  ;;  %2356 = vmatprep.subr.bf16.mxu1 %v3000_v0 }
 0x184   : > { %1034 = vmatpush1.bf16.msra.mxu0 %v2608_v5 }
 0x185   : > { %1035 = vmatprep.subr.bf16.mxu0 %v3007_v6 }
 0x186   : > { %2357 = vmatpush3.bf16.msra.mxu1 %v2606_v37  ;;  %v2188_v37 = vld [vmem:[#allocation8] ss:$0 sm:$0xff] }
 0x187   : > { %2358 = vmatprep.subr.bf16.mxu1 %v3000_v0 }
 0x188   : > { %1036 = vmatpush1.bf16.msra.mxu0 %v2609_v7 }
 0x189   : > { %1037 = vmatprep.subr.bf16.mxu0 %v3007_v6 }
 0x18a   : > { %2359 = vmatpush3.bf16.msra.mxu1 %v817_v39  ;;  %v2205_v39 = vld [vmem:[%s3698_s24] ss:$0 sm:$0xff]  ;;  %s2267_s24 = sshll.u32 %s3107_s19, 4  ;;  %s3010_s19 = smov [#allocation16]  }
 0x18b   : > { %1243 = vmatprep.subr.bf16.mxu1 %v3007_v6  ;;  %s2908_s23 = sshll.u32 %s3010_s19, 4  ;;  %s2909_s23 = int_to_ptr.vmem [resolvable:$false] %s2908_s23 }
 0x18c   : > { %1038 = vmatpush1.bf16.msra.mxu0 %v2610_v8  ;;  %p2911_p2 = scmp.lt.s32.totalorder %s3609_s17, %s2909_s23 }
 0x18d   : > { %1039 = vmatprep.subr.bf16.mxu0 %v3007_v6 }
 0x190   : > { %1040 = vmatpush1.bf16.msra.mxu0 %v2611_v9 }
 0x191   : > { %1041 = vmatprep.subr.bf16.mxu0 %v3007_v6 }
 0x194   : > { %1042 = vmatpush1.bf16.msra.mxu0 %v2612_v10 }
 0x195   : > { %1043 = vmatprep.subr.bf16.mxu0 %v3007_v6 }
 0x198   : > { %1044 = vmatpush1.bf16.msra.mxu0 %v2613_v11 }
 0x199   : > { %1045 = vmatprep.subr.bf16.mxu0 %v3007_v6 }
 0x19c   : > { %1046 = vmatpush1.bf16.msra.mxu0 %v2614_v12 }
 0x19d   : > { %1047 = vmatprep.subr.bf16.mxu0 %v3007_v6 }
 0x1a0   : > { %1048 = vmatpush1.bf16.msra.mxu0 %v2615_v13 }
 0x1a1   : > { %1049 = vmatprep.subr.bf16.mxu0 %v3007_v6 }
 0x1a4   : > { %1050 = vmatpush1.bf16.msra.mxu0 %v2616_v14  ;;  %v2638_v14 = vld [vmem:[#allocation13] sm:$0xff]  }
 0x1a5   : > { %1051 = vmatprep.subr.bf16.mxu0 %v3007_v6 }
 0x1a8   : > { %1052 = vmatpush1.bf16.msra.mxu0 %v2617_v15 }
 0x1a9   : > { %1053 = vmatprep.subr.bf16.mxu0 %v3007_v6 }
 0x1ac   : > { %1054 = vmatpush1.bf16.msra.mxu0 %v2618_v16 }
 0x1ad   : > { %1055 = vmatprep.subr.bf16.mxu0 %v3007_v6 }
 0x1b0   : > { %1056 = vmatpush1.bf16.msra.mxu0 %v2619_v17  ;;  %v2640_v17 = vld [vmem:[#allocation13 + $0x8] sm:$0xff]  }
 0x1b1   : > { %1057 = vmatprep.subr.bf16.mxu0 %v3007_v6 }
 0x1b4   : > { %1058 = vmatpush1.bf16.msra.mxu0 %v2620_v18  ;;  %v2641_v18 = vld [vmem:[#allocation13 + $0x28] sm:$0xff]  }
 0x1b5   : > { %1059 = vmatprep.subr.bf16.mxu0 %v3007_v6 }
 0x1b8   : > { %1060 = vmatpush1.bf16.msra.mxu0 %v2621_v19  ;;  %v2642_v19 = vld [vmem:[#allocation13 + $0x10] sm:$0xff]  }
 0x1b9   : > { %1061 = vmatprep.subr.bf16.mxu0 %v3007_v6 }
 0x1bc   : > { %1062 = vmatpush1.bf16.msra.mxu0 %v2622_v20  ;;  %v2643_v20 = vld [vmem:[#allocation13 + $0x30] sm:$0xff]  }
 0x1bd   : > { %2364 = vmatprep.subr.bf16.mxu0 %v3000_v0 }
 0x24e   : > { %v662_v40 = vpop.f32.mrb[0].mxu0  ;;  %v710_v41 = vpop.f32.mrb[0].mxu1 }
 0x24f   : > { %v716_v42 = vpack.c.bf16 %v710_v41, %v710_v41  ;;  %v2334_v43 = vpop.f32.mrb[1].mxu0  ;;  %v2342_v44 = vpop.f32.mrb[1].mxu1  ;;  %v668_v55 = vpack.c.bf16 %v662_v40, %v662_v40 }
 0x250   : > { %v665_v45 = vpop.f32.mrb[2].mxu0  ;;  %v713_v46 = vpop.f32.mrb[2].mxu1 }
 0x251   : > { %766 = vrot.lane.b32.xlu0 %v716_v42, %s3004_s18  ;;  %v2335_v47 = vpop.f32.mrb[3].mxu0  ;;  %v2343_v48 = vpop.f32.mrb[3].mxu1  ;;  %s3699_s18 = sld [smem:[#allocation25_spill]] }
 0x252   : > { %v2623_v47 = vld [vmem:[#allocation10] sm:$0xff]   ;;  %v2624_v48 = vld [vmem:[#allocation10 + $0x8] sm:$0xff]  }
 0x256   : > { %v758_v49 = vpop.f32.mrb[4].mxu0 }
 0x257   : > { %v764_v50 = vpack.c.bf16 %v758_v49, %v758_v49  ;;  %v2350_v51 = vpop.f32.mrb[5].mxu0  ;;  %v2625_v49 = vld [vmem:[#allocation10 + $0x10] sm:$0xff]  }
 0x258   : > { %v761_v52 = vpop.f32.mrb[6].mxu0  ;;  %v2627_v51 = vld [vmem:[#allocation10 + $0x20] sm:$0xff]  }
 0x259   : > { %769 = vrot.lane.b32.xlu1 %v764_v50, %s3005_s9  ;;  %v2351_v53 = vpop.f32.mrb[7].mxu0  ;;  %v2626_v50 = vld [vmem:[#allocation10 + $0x18] sm:$0xff]   ;;  %v2628_v52 = vld [vmem:[#allocation10 + $0x28] sm:$0xff]  }
 0x25a   : > { %v2629_v53 = vld [vmem:[#allocation10 + $0x30] sm:$0xff]  }
 0x2c3   : > { %v767_v54 = vpop.permute.xlu0 %766 }
 0x2c4   : > { %v773_v56 = vsel %vm621_vm9, %v668_v55, %v767_v54  ;;  %v2630_v54 = vld [vmem:[#allocation10 + $0x38] sm:$0xff]   ;;  %v2631_v55 = vld [vmem:[#allocation10 + $0x40] sm:$0xff]  }
 0x2cb   : > { %v770_v57 = vpop.permute.xlu1 %769 }
 0x2cc   : > { %v776_v58 = vsel %vm774_vm12, %v773_v56, %v770_v57  ;;  %v2632_v56 = vld [vmem:[#allocation10 + $0x48] sm:$0xff]   ;;  %v2633_v57 = vld [vmem:[#allocation10 + $0x50] sm:$0xff]  }
 0x2cd   : > { %2361 = vmatmul.mubr.msk.bf16.vlgmr.msra.gmra.mrb[4].mxu1 %vm812_vm13, %v776_v58  ;;  %v2634_v58 = vld [vmem:[#allocation10 + $0x58] sm:$0xff]  }
 0x2ce   : > { %1244 = vmatpush1.bf16.msra.mxu1 %v2623_v47  ;;  %v2656_v47 = vld [vmem:[#allocation13 + $0xa8] sm:$0xff]  }
 0x2cf   : > { %1245 = vmatprep.subr.bf16.mxu1 %v3007_v6 }
 0x2d2   : > { %1246 = vmatpush1.bf16.msra.mxu1 %v2624_v48  ;;  %v2657_v48 = vld [vmem:[#allocation13 + $0x88] sm:$0xff]  }
 0x2d3   : > { %1247 = vmatprep.subr.bf16.mxu1 %v3007_v6 }
 0x2d6   : > { %1248 = vmatpush1.bf16.msra.mxu1 %v2625_v49  ;;  %v2658_v49 = vld [vmem:[#allocation13 + $0xb0] sm:$0xff]  }
 0x2d7   : > { %1249 = vmatprep.subr.bf16.mxu1 %v3007_v6 }
 0x2da   : > { %1250 = vmatpush1.bf16.msra.mxu1 %v2626_v50  ;;  %v2659_v50 = vld [vmem:[#allocation13 + $0x90] sm:$0xff]  }
 0x2db   : > { %1251 = vmatprep.subr.bf16.mxu1 %v3007_v6 }
 0x2de   : > { %1252 = vmatpush1.bf16.msra.mxu1 %v2627_v51  ;;  %v2660_v51 = vld [vmem:[#allocation13 + $0xb8] sm:$0xff]  }
 0x2df   : > { %1253 = vmatprep.subr.bf16.mxu1 %v3007_v6 }
 0x2e2   : > { %1254 = vmatpush1.bf16.msra.mxu1 %v2628_v52  ;;  %v2661_v52 = vld [vmem:[#allocation13 + $0x98] sm:$0xff]  }
 0x2e3   : > { %1255 = vmatprep.subr.bf16.mxu1 %v3007_v6 }
 0x2e6   : > { %1256 = vmatpush1.bf16.msra.mxu1 %v2629_v53  ;;  %v2662_v53 = vld [vmem:[#allocation13 + $0xe0] sm:$0xff]  }
 0x2e7   : > { %1257 = vmatprep.subr.bf16.mxu1 %v3007_v6 }
 0x2ea   : > { %1258 = vmatpush1.bf16.msra.mxu1 %v2630_v54 }
 0x2eb   : > { %1259 = vmatprep.subr.bf16.mxu1 %v3007_v6 }
 0x2ee   : > { %1260 = vmatpush1.bf16.msra.mxu1 %v2631_v55  ;;  %v2663_v55 = vld [vmem:[#allocation13 + $0xc0] sm:$0xff]  }
 0x2ef   : > { %1261 = vmatprep.subr.bf16.mxu1 %v3007_v6 }
 0x2f2   : > { %1262 = vmatpush1.bf16.msra.mxu1 %v2632_v56 }
 0x2f3   : > { %1263 = vmatprep.subr.bf16.mxu1 %v3007_v6 }
 0x2f6   : > { %1264 = vmatpush1.bf16.msra.mxu1 %v2633_v57  ;;  %v2664_v57 = vld [vmem:[#allocation13 + $0xe8] sm:$0xff]  }
 0x2f7   : > { %1265 = vmatprep.subr.bf16.mxu1 %v3007_v6 }
 0x2fa   : > { %1266 = vmatpush1.bf16.msra.mxu1 %v2634_v58  ;;  %v2665_v58 = vld [vmem:[#allocation13 + $0xc8] sm:$0xff]  }
 0x2fb   : > { %1267 = vmatprep.subr.bf16.mxu1 %v3007_v6 }
 0x3a0   : > { %v853_v60 = vpop.f32.mrb[4].mxu1 }
 0x3a1   : > { %v854_v62 = vadd.f32 %v2181_v59, %v853_v60  ;;  %v2362_v63 = vpop.f32.mrb[5].mxu1  ;;  %v2635_v59 = vld [vmem:[#allocation10 + $0x60] sm:$0xff]   ;;  %v2636_v60 = vld [vmem:[#allocation10 + $0x68] sm:$0xff]  }
 0x3a2   : > { %v856_v1 = vpop.f32.mrb[6].mxu1  ;;  %1268 = vmatpush1.bf16.msra.mxu1 %v2635_v59  ;;  %v2666_v59 = vld [vmem:[#allocation13 + $0xf0] sm:$0xff]  }
 0x3a3   : > { %v867_v2 = vmul.f32 %v2187_v61, %v854_v62  ;;  %v2363_v3 = vpop.f32.mrb[7].mxu1  ;;  %vm859_vm14 = vcmp.ge.f32.partialorder %v854_v62, 0.0  ;;  %1269 = vmatprep.subr.bf16.mxu1 %v3007_v6  ;;  %v2637_v61 = vld [vmem:[#allocation10 + $0x70] sm:$0xff]  }
 0x3a4   : > { %v2639_v3 = vld [vmem:[#allocation13 + $0x20] sm:$0xff]  }
 0x3a5   : > { %v3453_v4 = vsel %vm859_vm14, %v854_v62, %v867_v2 }
 0x3a6   : > { %870 = vrot.lane.b32.xlu1 %v3453_v4, %s3006_s28  ;;  %1270 = vmatpush1.bf16.msra.mxu1 %v2636_v60  ;;  %v2667_v60 = vld [vmem:[#allocation13 + $0xd0] sm:$0xff]  }
 0x3a7   : > { %1271 = vmatprep.subr.bf16.mxu1 %v3007_v6 }
 0x3aa   : > { %1272 = vmatpush1.bf16.msra.mxu1 %v2637_v61  ;;  %v2668_v61 = vld [vmem:[#allocation13 + $0xf8] sm:$0xff]  }
 0x3ab   : > { %2376 = vmatprep.subr.bf16.mxu1 %v3000_v0 }
 0x418   : > { %v871_v21 = vpop.permute.xlu1 %870 }
 0x419   : > { %v874_v22 = vsel %vm873_vm15, 0.0, %v871_v21  ;;  %v2644_v21 = vld [vmem:[#allocation13 + $0x18] sm:$0xff]  }
 0x41a   : > { %v876_v23 = vsel %vm875_vm1, %v874_v22, 0.0  ;;  %v2645_v22 = vld [vmem:[#allocation13 + $0x38] sm:$0xff]  }
 0x41b   : > { %v878_v24 = vrot.slane %v876_v23, 7  ;;  %v2206_v23 = vld [vmem:[#allocation11] ss:$0 sm:$0xff] }
 0x41d   : > { %v880_v25 = vsel %vm602_vm3, 0.0, %v878_v24  ;;  %v881_v26 = vsel %vm602_vm3, %v878_v24, 0.0 }
 0x41e   : > { %v882_v27 = vpack.c.bf16 %v881_v26, %v880_v25  ;;  %v2223_v25 = vld [vmem:[%s3699_s18] ss:$0 sm:$0xff] }
 0x420   : > { %v893_v28 = vrot.slane %v882_v27, 1  ;;  %v886_v29 = vshll.u32 %v882_v27, 16  ;;  %v884_v30 = vshrl.u32 %v882_v27, 16 }
 0x422   : > { %894 = vrot.lane.b32.xlu1 %v893_v28, %s3008_s6  ;;  %v888_v31 = vrot.slane %v886_v29, 1 }
 0x424   : > { %v889_v32 = vor.u32 %v888_v31, %v884_v30 }
 0x426   : > { %890 = vrot.lane.b32.xlu0 %v889_v32, %s3009_s12 }
 0x494   : > { %v895_v33 = vpop.permute.xlu1 %894 }
 0x498   : > { %v891_v34 = vpop.permute.xlu0 %890 }
 0x499   : > { %v898_v35 = vsel %vm896_vm2, %v882_v27, %v891_v34  ;;  %v902_v36 = vsel %vm900_vm4, %v891_v34, %v895_v33  ;;  %v2646_v33 = vld [vmem:[#allocation13 + $0x60] sm:$0xff]  }
 0x49a   : > { %2204 = vmatprep.mubr.msk.bf16.mxu0 %vm1030_vm5, %v902_v36 }
 0x49b   : > { %1066 = vmatmul.mubr.bf16.vlgmr.msra.gmra.mrb[8].mxu0 %v898_v35  ;;  %v2647_v35 = vld [vmem:[#allocation13 + $0x40] sm:$0xff]  }
 0x49c   : > { %2372 = vmatprep.mubr.msk.bf16.mxu0 %vm3002_vm0, %v3000_v0  ;;  %2365 = vmatpush3.bf16.msra.mxu0 %v2639_v3 }
 0x49d   : > { %2366 = vmatprep.subr.bf16.mxu0 %v3000_v0 }
 0x4a0   : > { %2367 = vmatpush3.bf16.msra.mxu0 %v2641_v18 }
 0x4a1   : > { %2368 = vmatprep.subr.bf16.mxu0 %v3000_v0 }
 0x4a4   : > { %2369 = vmatpush3.bf16.msra.mxu0 %v2643_v20 }
 0x4a5   : > { %2370 = vmatprep.subr.bf16.mxu0 %v3000_v0 }
 0x4a8   : > { %2371 = vmatpush3.bf16.msra.mxu0 %v2645_v22 }
 0x4a9   : > { %2388 = vmatprep.subr.bf16.mxu0 %v3000_v0 }
 0x56e   : > { %v1067_v38 = vpop.f32.mrb[8].mxu0 }
 0x56f   : > { %v1068_v40 = vadd.f32 %v2188_v37, %v1067_v38  ;;  %v1069_v41 = vpop.f32.mrb[9].mxu0  ;;  %v2648_v37 = vld [vmem:[#allocation13 + $0x68] sm:$0xff]  }
 0x570   : > { %v1070_v42 = vpop.f32.mrb[10].mxu0  ;;  %v2649_v38 = vld [vmem:[#allocation13 + $0x48] sm:$0xff]   ;;  %v2652_v41 = vld [vmem:[#allocation13 + $0x78] sm:$0xff]  }
 0x571   : > { %vm1073_vm6 = vcmp.ge.f32.partialorder %v1068_v40, 0.0  ;;  %v1081_v43 = vmul.f32 %v2205_v39, %v1068_v40  ;;  %v1071_v44 = vpop.f32.mrb[11].mxu0  ;;  %v2650_v39 = vld [vmem:[#allocation13 + $0x70] sm:$0xff]   ;;  %v2653_v42 = vld [vmem:[#allocation13 + $0x58] sm:$0xff]  }
 0x573   : > { %v1082_v45 = vsel %vm1073_vm6, %v1068_v40, %v1081_v43  ;;  %v2651_v40 = vld [vmem:[#allocation13 + $0x50] sm:$0xff]   ;;  %v2654_v43 = vld [vmem:[#allocation13 + $0xa0] sm:$0xff]  }
 0x574   : > { %v3489_v46 = vadd.f32 %v1082_v45, %v3453_v4  ;;  %v2655_v45 = vld [vmem:[#allocation13 + $0x80] sm:$0xff]  }
 0x576   : > { %1085 = vrot.lane.b32.xlu0 %v3489_v46, %s3006_s28  ;;  %s3607_s28 = scalar_lea.hbm %s3702_s27, %s2267_s24 }
 0x5e8   : > { %v1086_v62 = vpop.permute.xlu0 %1085 }
 0x5e9   : > { %v1088_v63 = vsel %vm873_vm15, 0.0, %v1086_v62  ;;  %v2669_v62 = vld [vmem:[#allocation13 + $0xd8] sm:$0xff]  }
 0x5ea   : > { %v1089_v1 = vsel %vm875_vm1, %v1088_v63, 0.0 }
 0x5eb   : > { %v1091_v2 = vrot.slane %v1089_v1, 7 }
 0x5ed   : > { %v1093_v4 = vsel %vm602_vm3, 0.0, %v1091_v2  ;;  %v1094_v5 = vsel %vm602_vm3, %v1091_v2, 0.0 }
 0x5ee   : > { %v1095_v7 = vpack.c.bf16 %v1094_v5, %v1093_v4 }
 0x5f0   : > { %v1106_v6 = vrot.slane %v1095_v7, 1  ;;  %v1099_v8 = vshll.u32 %v1095_v7, 16  ;;  %v1097_v9 = vshrl.u32 %v1095_v7, 16 }
 0x5f2   : > { %1107 = vrot.lane.b32.xlu0 %v1106_v6, %s3008_s6  ;;  %v1101_v10 = vrot.slane %v1099_v8, 1  ;;  %s1997_s6 = scalar_lea.sflag [#allocation4], %s3375_s26 }
 0x5f4   : > { %v1102_v11 = vor.u32 %v1101_v10, %v1097_v9 }
 0x5f6   : > { %1103 = vrot.lane.b32.xlu1 %v1102_v11, %s3009_s12  ;;  %s2904_s12 = scalar_lea.vmem %s3609_s17, 16 }
 0x5f7   : > { %p2905_p4 = scmp.ne.s32.totalorder %s3609_s17, %s2904_s12 }
 0x5f9   : > { %p2906_p13 = pnand %p2905_p4, %p3703_p1 }
 0x5fb   : > { %p2907_p0 = pneg %p2906_p13 }
 0x664   : > { %v1108_v12 = vpop.permute.xlu0 %1107 }
 0x668   : > { %v1104_v13 = vpop.permute.xlu1 %1103 }
 0x669   : > { %v1110_v15 = vsel %vm896_vm2, %v1095_v7, %v1104_v13  ;;  %v1113_v16 = vsel %vm900_vm4, %v1104_v13, %v1108_v12 }
 0x66a   : > { %2222 = vmatprep.mubr.msk.bf16.mxu1 %vm1030_vm5, %v1113_v16 }
 0x66b   : > { %1276 = vmatmul.mubr.bf16.vlgmr.msra.gmra.mrb[8].mxu1 %v1110_v15 }
 0x66c   : > { %2377 = vmatpush3.bf16.msra.mxu1 %v2638_v14  ;;  %2384 = vmatprep.mubr.msk.bf16.mxu1 %vm3002_vm0, %v3000_v0 }
 0x66d   : > { %2378 = vmatprep.subr.bf16.mxu1 %v3000_v0 }
 0x670   : > { %2379 = vmatpush3.bf16.msra.mxu1 %v2640_v17 }
 0x671   : > { %2380 = vmatprep.subr.bf16.mxu1 %v3000_v0 }
 0x674   : > { %2381 = vmatpush3.bf16.msra.mxu1 %v2642_v19 }
 0x675   : > { %2382 = vmatprep.subr.bf16.mxu1 %v3000_v0 }
 0x678   : > { %2383 = vmatpush3.bf16.msra.mxu1 %v2644_v21 }
 0x679   : > { %2400 = vmatprep.subr.bf16.mxu1 %v3000_v0 }
 0x73e   : > { %v1277_v24 = vpop.f32.mrb[8].mxu1 }
 0x73f   : > { %v1278_v26 = vadd.f32 %v2206_v23, %v1277_v24  ;;  %v1279_v27 = vpop.f32.mrb[9].mxu1 }
 0x740   : > { %v1280_v28 = vpop.f32.mrb[10].mxu1 }
 0x741   : > { %vm1283_vm3 = vcmp.ge.f32.partialorder %v1278_v26, 0.0  ;;  %v1291_v29 = vmul.f32 %v2223_v25, %v1278_v26  ;;  %v1281_v30 = vpop.f32.mrb[11].mxu1 }
 0x743   : > { %v1292_v31 = vsel %vm1283_vm3, %v1278_v26, %v1291_v29 }
 0x744   : > { %v1293_v32 = vadd.f32 %v1292_v31, %v3489_v46 }
 0x746   : > { %v3531_v34 = vpack.c.bf16 %v1293_v32, %v1293_v32 }
 0x748   : > { %2385 = vmatmul.mubr.msk.bf16.vlgmr.msra.gmra.mrb[12].mxu1 %vm1338_vm7, %v3531_v34  ;;  %v3536_v36 = vshrl.u32 %v3531_v34, 16  ;;  %v1457_v46 = vrot.slane %v3531_v34, 1  ;;  %v1611_v56 = vrot.slane %v3531_v34, 2  ;;  %v1765_v1 = vrot.slane %v3531_v34, 3 }
 0x749   : > { %2401 = vmatpush3.bf16.msra.mxu1 %v2646_v33  ;;  %2408 = vmatprep.mubr.msk.bf16.mxu1 %vm3002_vm0, %v3000_v0 }
 0x74a   : > { %2373 = vmatmul.mubr.msk.bf16.vlgmr.msra.gmra.mrb[12].mxu0 %vm1338_vm7, %v3536_v36  ;;  %2402 = vmatprep.subr.bf16.mxu1 %v3000_v0  ;;  %v1534_v44 = vrot.slane %v3536_v36, 1  ;;  %v1688_v54 = vrot.slane %v3536_v36, 2  ;;  %v1842_v63 = vrot.slane %v3536_v36, 3 }
 0x74b   : > { %2389 = vmatpush3.bf16.msra.mxu0 %v2647_v35  ;;  %2396 = vmatprep.mubr.msk.bf16.mxu0 %vm3002_vm0, %v3000_v0 }
 0x74c   : > { %2390 = vmatprep.subr.bf16.mxu0 %v3000_v0 }
 0x74d   : > { %2403 = vmatpush3.bf16.msra.mxu1 %v2648_v37 }
 0x74e   : > { %2404 = vmatprep.subr.bf16.mxu1 %v3000_v0 }
 0x74f   : > { %2391 = vmatpush3.bf16.msra.mxu0 %v2649_v38 }
 0x750   : > { %2392 = vmatprep.subr.bf16.mxu0 %v3000_v0 }
 0x751   : > { %2405 = vmatpush3.bf16.msra.mxu1 %v2650_v39  ;;  %v1911_v39 = vld [vmem:[#allocation14] sm:$0x1] }
 0x752   : > { %2406 = vmatprep.subr.bf16.mxu1 %v3000_v0 }
 0x753   : > { %2393 = vmatpush3.bf16.msra.mxu0 %v2651_v40 }
 0x754   : > { %2394 = vmatprep.subr.bf16.mxu0 %v3000_v0 }
 0x755   : > { %2407 = vmatpush3.bf16.msra.mxu1 %v2652_v41 }
 0x756   : > { %2424 = vmatprep.subr.bf16.mxu1 %v3000_v0 }
 0x757   : > { %2395 = vmatpush3.bf16.msra.mxu0 %v2653_v42 }
 0x758   : > { %2409 = vmatmul.mubr.msk.bf16.vlgmr.msra.gmra.mrb[16].mxu1 %vm1338_vm7, %v1534_v44  ;;  %2412 = vmatprep.subr.bf16.mxu0 %v3000_v0 }
 0x759   : > { %2425 = vmatpush3.bf16.msra.mxu1 %v2654_v43  ;;  %2432 = vmatprep.mubr.msk.bf16.mxu1 %vm3002_vm0, %v3000_v0 }
 0x75a   : > { %2397 = vmatmul.mubr.msk.bf16.vlgmr.msra.gmra.mrb[16].mxu0 %vm1338_vm7, %v1457_v46  ;;  %2426 = vmatprep.subr.bf16.mxu1 %v3000_v0  ;;  %v2671_v46 = vld [vmem:[%s3700_s20 + $0x8] sm:$0xff]  }
 0x75b   : > { %2413 = vmatpush3.bf16.msra.mxu0 %v2655_v45  ;;  %2420 = vmatprep.mubr.msk.bf16.mxu0 %vm3002_vm0, %v3000_v0  ;;  %v2670_v45 = vld [vmem:[%s3700_s20] sm:$0xff]  }
 0x75c   : > { %2414 = vmatprep.subr.bf16.mxu0 %v3000_v0 }
 0x75d   : > { %2427 = vmatpush3.bf16.msra.mxu1 %v2656_v47 }
 0x75e   : > { %2428 = vmatprep.subr.bf16.mxu1 %v3000_v0 }
 0x75f   : > { %2415 = vmatpush3.bf16.msra.mxu0 %v2657_v48 }
 0x760   : > { %2416 = vmatprep.subr.bf16.mxu0 %v3000_v0 }
 0x761   : > { %2429 = vmatpush3.bf16.msra.mxu1 %v2658_v49 }
 0x762   : > { %2430 = vmatprep.subr.bf16.mxu1 %v3000_v0 }
 0x763   : > { %2417 = vmatpush3.bf16.msra.mxu0 %v2659_v50 }
 0x764   : > { %2418 = vmatprep.subr.bf16.mxu0 %v3000_v0 }
 0x765   : > { %2431 = vmatpush3.bf16.msra.mxu1 %v2660_v51 }
 0x766   : > { %2448 = vmatprep.subr.bf16.mxu1 %v3000_v0 }
 0x767   : > { %2419 = vmatpush3.bf16.msra.mxu0 %v2661_v52  ;;  %v1926_v52 = vld [vmem:[%s3701_s2] sm:$0x1]  ;;  %s2910_s2 = scalar_lea.vmem %s2909_s23, 32 }
 0x768   : > { %2433 = vmatmul.mubr.msk.bf16.vlgmr.msra.gmra.mrb[20].mxu1 %vm1338_vm7, %v1688_v54  ;;  %2436 = vmatprep.subr.bf16.mxu0 %v3000_v0  ;;  %p2912_p8 = scmp.lt.s32.totalorder %s2910_s2, %s2904_s12 }
 0x769   : > { %2449 = vmatpush3.bf16.msra.mxu1 %v2662_v53  ;;  %2456 = vmatprep.mubr.msk.bf16.mxu1 %vm3002_vm0, %v3000_v0 }
 0x76a   : > { %2421 = vmatmul.mubr.msk.bf16.vlgmr.msra.gmra.mrb[20].mxu0 %vm1338_vm7, %v1611_v56  ;;  %2450 = vmatprep.subr.bf16.mxu1 %v3000_v0  ;;  %p2913_p6 = por %p2912_p8, %p2911_p2 }
 0x76b   : > { %2437 = vmatpush3.bf16.msra.mxu0 %v2663_v55  ;;  %2444 = vmatprep.mubr.msk.bf16.mxu0 %vm3002_vm0, %v3000_v0 }
 0x76c   : > { %2438 = vmatprep.subr.bf16.mxu0 %v3000_v0  ;;  %p2914_p11 = pnand %p2913_p6, %p2907_p0 }
 0x76d   : > { %2451 = vmatpush3.bf16.msra.mxu1 %v2664_v57 }
 0x76e   : > { %2452 = vmatprep.subr.bf16.mxu1 %v3000_v0 }
 0x76f   : > { %2439 = vmatpush3.bf16.msra.mxu0 %v2665_v58 }
 0x770   : > { %2440 = vmatprep.subr.bf16.mxu0 %v3000_v0 }
 0x771   : > { %2453 = vmatpush3.bf16.msra.mxu1 %v2666_v59 }
 0x772   : > { %2454 = vmatprep.subr.bf16.mxu1 %v3000_v0 }
 0x773   : > { %2441 = vmatpush3.bf16.msra.mxu0 %v2667_v60 }
 0x774   : > { %2442 = vmatprep.subr.bf16.mxu0 %v3000_v0 }
 0x775   : > { %2455 = vmatpush3.bf16.msra.mxu1 %v2668_v61 }
 0x777   : > { %2443 = vmatpush3.bf16.msra.mxu0 %v2669_v62 }
 0x778   : > { %2457 = vmatmul.mubr.msk.bf16.vlgmr.msra.gmra.mrb[24].mxu1 %vm1338_vm7, %v1842_v63  ;;  %2460 = vmatprep.subr.bf16.mxu0 %v3000_v0 }
 0x77a   : > { %2445 = vmatmul.mubr.msk.bf16.vlgmr.msra.gmra.mrb[24].mxu0 %vm1338_vm7, %v1765_v1 }
 0x77b   : > { %2464 = vmatprep.mubr.msk.bf16.mxu0 %vm3002_vm0, %v3000_v0  ;;  %vm1914_vm0 = vcmask 253952   ;;  %2461 = vmatpush3.bf16.msra.mxu0 %v2670_v45 }
 0x77c   : > { %2462 = vmatprep.subr.bf16.mxu0 %v3000_v0 }
 0x77f   : > { %2463 = vmatpush3.bf16.msra.mxu0 %v2671_v46 }
 0x81b   : > { %v1442_v2 = vpop.f32.mrb[12].mxu1 }
 0x81c   : > { %v2386_v3 = vpop.f32.mrb[13].mxu1 }
 0x81d   : > { %v1376_v4 = vpop.f32.mrb[12].mxu0  ;;  %v1445_v5 = vpop.f32.mrb[14].mxu1 }
 0x81e   : > { %v1443_v7 = vadd.f32 %v1442_v2, %v1376_v4  ;;  %v2374_v6 = vpop.f32.mrb[13].mxu0  ;;  %v2387_v8 = vpop.f32.mrb[15].mxu1 }
 0x81f   : > { %v1379_v9 = vpop.f32.mrb[14].mxu0 }
 0x820   : > { %v2375_v10 = vpop.f32.mrb[15].mxu0 }
 0x82b   : > { %v1596_v11 = vpop.f32.mrb[16].mxu1 }
 0x82c   : > { %v2410_v12 = vpop.f32.mrb[17].mxu1 }
 0x82d   : > { %v1519_v13 = vpop.f32.mrb[16].mxu0  ;;  %v1599_v14 = vpop.f32.mrb[18].mxu1 }
 0x82e   : > { %v1525_v15 = vadd.f32 %v1519_v13, %v1443_v7  ;;  %v2398_v16 = vpop.f32.mrb[17].mxu0  ;;  %v2411_v17 = vpop.f32.mrb[19].mxu1 }
 0x82f   : > { %v1522_v18 = vpop.f32.mrb[18].mxu0 }
 0x830   : > { %v2399_v19 = vpop.f32.mrb[19].mxu0  ;;  %v1602_v20 = vadd.f32 %v1596_v11, %v1525_v15 }
 0x83b   : > { %v1750_v21 = vpop.f32.mrb[20].mxu1 }
 0x83c   : > { %v2434_v22 = vpop.f32.mrb[21].mxu1 }
 0x83d   : > { %v1673_v23 = vpop.f32.mrb[20].mxu0  ;;  %v1753_v24 = vpop.f32.mrb[22].mxu1 }
 0x83e   : > { %v1679_v25 = vadd.f32 %v1673_v23, %v1602_v20  ;;  %v2422_v26 = vpop.f32.mrb[21].mxu0  ;;  %v2435_v27 = vpop.f32.mrb[23].mxu1 }
 0x83f   : > { %v1676_v28 = vpop.f32.mrb[22].mxu0 }
 0x840   : > { %v2423_v29 = vpop.f32.mrb[23].mxu0  ;;  %v1756_v30 = vadd.f32 %v1750_v21, %v1679_v25 }
 0x84b   : > { %v1904_v31 = vpop.f32.mrb[24].mxu1 }
 0x84c   : > { %v2458_v32 = vpop.f32.mrb[25].mxu1 }
 0x84d   : > { %v1827_v33 = vpop.f32.mrb[24].mxu0  ;;  %v1907_v34 = vpop.f32.mrb[26].mxu1 }
 0x84e   : > { %v1833_v35 = vadd.f32 %v1827_v33, %v1756_v30  ;;  %v2446_v36 = vpop.f32.mrb[25].mxu0  ;;  %v2459_v37 = vpop.f32.mrb[27].mxu1 }
 0x84f   : > { %v1830_v38 = vpop.f32.mrb[26].mxu0 }
 0x850   : > { %v1910_v40 = vadd.f32 %v1904_v31, %v1833_v35  ;;  %v2447_v41 = vpop.f32.mrb[27].mxu0 }
 0x852   : > { %v1912_v42 = vadd.f32 %v1911_v39, %v1910_v40 }
 0x854   : > { %v1913_v43 = vmul.f32 %v1912_v42, %v1912_v42 }
 0x856   : > { %v1915_v44 = vsel %vm1914_vm0, %v1913_v43, 0.0 }
 0x857   : > { %1916 = vadd.xlane.f32.xlu1 %v1915_v44 }
 0x8e4   : > { %v1917_v47 = vpop.xlane.xlu1 %1916 }
 0x8e5   : > { %v1918_v48 = vadd.f32 1e-12, %v1917_v47 }
 0x8e7   : > { %2672 = vrsqrt.f32 %v1918_v48 }
 0x8f1   : > { %v2673_v49 = vpop.eup %2672 }
 0x8f2   : > { %v1920_v50 = vmul.f32 %v2673_v49, %v1912_v42 }
 0x8f4   : > { %v1921_v51 = vpack.c.bf16 %v1920_v50, %v1920_v50 }
 0x8f6   : > { %2465 = vmatmul.mubr.msk.bf16.vlgmr.msra.gmra.mrb[28].mxu0 %vm900_vm4, %v1921_v51 }
 0x9c9   : > { %v1976_v53 = vpop.f32.mrb[28].mxu0 }
 0x9ca   : > { %v1977_v0 = vadd.f32 %v1976_v53, %v1926_v52  ;;  %v2466_v54 = vpop.f32.mrb[29].mxu0 }
 0x9cb   : > { %v1979_v55 = vpop.f32.mrb[30].mxu0 }
 0x9cc   : > { %v2467_v56 = vpop.f32.mrb[31].mxu0  ;;  %v1983_v57 = vsel %vm1982_vm8, %v1977_v0, -inf }
 0x9cd   : > { %1984 = vmax.xlane.f32.xlu0 %v1983_v57 }
 0xa5a   : > { %v1985_v58 = vpop.xlane.xlu0 %1984 }
 0xa5b   : > { %v1986_v59 = vsub.f32 %v1977_v0, %v1985_v58 }
 0xa5d   : > { %v1987_v60 = vmul.f32 1.442695, %v1986_v59 }
 0xa5f   : > { %2674 = vpow2.f32 %v1987_v60 }
 0xa69   : > { %v2675_v61 = vpop.eup %2674 }
 0xa6a   : > { %v1989_v62 = vsel %vm1982_vm8, %v2675_v61, 0.0 }
 0xa6b   : > { %1990 = vadd.xlane.f32.xlu0 %v1989_v62 }
 0xaf8   : > { %v1991_v63 = vpop.xlane.xlu0 %1990 }
 0xaf9   : > { %2676 = vlog2.f32 %v1991_v63 }
 0xb03   : > { %v2677_v1 = vpop.eup %2676 }
 0xb04   : > { %v1993_v2 = vmul.f32 0.6931472, %v2677_v1 }
 0xb06   : > { %v1994_v3 = vsub.f32 %v1986_v59, %v1993_v2 }
 0xb08   : > { %1995 = vst.msk [vmem:[%s578_s14] sm:$0x1] %vm1982_vm8, %v1994_v3 }
 0xb09   : > { %2917 = shalt.err (!%p2914_p11)
}
 0xb0a   : > { %s2918_s26 = scalar_lea.hbm %s3607_s28, 16  ;;  %s2922_s18 = scalar_lea.hbm %s3702_s27, 32 }
 0xb0b   : > { %p2919_p12 = scmp.ne.s32.totalorder %s3607_s28, %s2918_s26  ;;  %p2923_p9 = scmp.lt.u32.totalorder %s3607_s28, %s3702_s27 }
 0xb0c   : > { %p2924_p7 = scmp.lt.u32.totalorder %s2922_s18, %s2918_s26  ;;  %p2926_p4 = scmp.lt.u32.totalorder %s2918_s26, %s3607_s28 }
 0xb0d   : > { %p2920_p3 = pnand %p2919_p12, %p3703_p1 }
 0xb0e   : > { %p2925_p10 = por %p2924_p7, %p2923_p9 }
 0xb0f   : > { %p2921_p5 = pneg %p2920_p3 }
 0xb10   : > { %p2927_p13 = por %p2926_p4, %p2925_p10 }
 0xb12   : > { %p2928_p0 = pnand %p2927_p13, %p2921_p5 }
 0xb14   : > { %2931 = shalt.err (!%p2928_p0)
}
 0xb15   : > { %2498 = dma.vmem_to_hbm [thread:$0]  (%p3703_p1), %s3609_s17, 16, %s3607_s28, %s1997_s6  }
 0xb16 PF: > { %s2021_s12 = sand.u32 1, %s2974_s29   ;;  %p3704_p2 = scmp.ne.s32.totalorder %s3685_s22, 0 }
 0xb17   : > { %p3705_p8 = scmp.ge.s32.totalorder %s2986_s16, 2  ;;  %s2022_s23 = scalar_lea.sflag [#allocation4], %s2021_s12 }
 0xb19   : > { %p2527_p6 = pnand %p3705_p8, %p3704_p2 }
 0xb1b   : > { %2969 = dma.done.wait (!%p2527_p6), %s2022_s23, 16  }
 0xb1c   : > { %2971 = vsyncadd (!%p2527_p6), %s2022_s23, 4294967280  ;;  %p31_p11 = scmp.ge.s32.totalorder %s3302_s25, 4   ;;  %s3706_s29 = smov %s2978_s30 }
 0xb1d   : > { %s3707_s30 = smov %s2982_s15  ;;  %s3708_s15 = smov %s3314_s13 }
 0xb1e   : > { %s3709_s16 = smov %s3302_s25  ;;  %33 = sbr.rel (!%p31_p11) target bundleno = 16 (0x10), region = 149 }
 0xb25   :  { %2026 = vsyncpa [#allocation3], 1 }
 0xb26   :  { %2028 = vsyncpa [#allocation3 + $0x1], 1 }
 0xb27   :  { %2029 = vsyncpa [#allocation6], 1 }
 0xb28   :  { %2030 = vsyncpa [#allocation9], 1 }
 0xb29   :  { %2031 = vsyncpa [#allocation12], 1 }
 0xb2a   :  { %2032 = vsyncpa [#allocation15], 1 }
 0xb2b   :  { %2033 = vsyncpa [#allocation4], 1 }
 0xb2c   :  { %2035 = vsyncpa [#allocation4 + $0x1], 1 }

</bundles_post_ra>
